<compile_context>
chip_gen: v5e
topology: v5e:2x2
jax: 0.10.0
libtpu: 0.0.40
codegen_flags: <defaults>
</compile_context>

<pallas_src>
import functools

import jax
import jax.numpy as jnp
from jax.experimental import pallas as pl
from jax.experimental.pallas import tpu as pltpu


def _dicg_kernel(n_agents, hidden_size,
                 x_ref,      # (TB, n, sa_dim)
                 wsa_ref,    # (3, sa_dim, hidden)  : w1, wg1, wn1   (pre-transposed)
                 wh_ref,     # (4, hidden, hidden)  : w2, wa, wg2, wn2 (pre-transposed)
                 b_ref,      # (6, hidden)          : b1, b2, bg1, bn1, bg2, bn2
                 out_ref,    # (TB, n, hidden)
                 attn_ref):  # (TB, n, n)
    f32 = jnp.float32
    tb, n, sa_dim = x_ref.shape
    inv_n = 1.0 / float(n_agents)

    x = x_ref[...]                                   # (TB, n, sa_dim)
    xf = x.reshape(tb * n, sa_dim)                   # rows for the MXU

    relu = lambda v: jnp.maximum(v, 0.0)

    def linear(v, w, b_idx=None):
        # Weights are stored (in_dim, out_dim): v @ W, natural MXU layout.
        y = jnp.dot(v, w, preferred_element_type=f32)
        if b_idx is not None:
            y = y + b_ref[b_idx:b_idx + 1, :]        # static slice -> (1, hidden)
        return y

    w1, wg1, wn1 = wsa_ref[0], wsa_ref[1], wsa_ref[2]
    w2, wa, wg2, wn2 = wh_ref[0], wh_ref[1], wh_ref[2], wh_ref[3]

    # ----- EncoderLayer: relu(linear2(relu(linear1(x)))) -----
    h1 = relu(linear(xf, w1, 0))
    emb = relu(linear(h1, w2, 1))                    # (TB*n, hidden)

    # ----- AttentionModule (attention_type='general') -----
    q = linear(emb, wa)                              # (TB*n, hidden)
    embb = emb.reshape(tb, n, hidden_size)
    qb = q.reshape(tb, n, hidden_size)
    scores = jnp.einsum('bnk,bmk->bnm', qb, embb,
                        preferred_element_type=f32)  # (TB, n, n)
    m = jnp.max(scores, axis=-1, keepdims=True)
    e = jnp.exp(scores - m)
    denom = jnp.sum(e, axis=-1, keepdims=True)
    attn = e * pl.reciprocal(denom)                  # exact; softmax over last dim

    # ----- feat = (relu(gc1(x, attn)) + relu(nn_gc1(x))) / n_agents -----
    gx1 = linear(xf, wg1, 2).reshape(tb, n, hidden_size)
    g1 = jnp.einsum('bnm,bmh->bnh', attn, gx1, preferred_element_type=f32)
    n1 = relu(linear(xf, wn1, 3)).reshape(tb, n, hidden_size)
    feat = (relu(g1) + n1) * inv_n                   # (TB, n, hidden)

    # ----- out = (relu(gc2(feat, attn)) + relu(nn_gc2(feat))) / n_agents -----
    featf = feat.reshape(tb * n, hidden_size)
    gx2 = linear(featf, wg2, 4).reshape(tb, n, hidden_size)
    g2 = jnp.einsum('bnm,bmh->bnh', attn, gx2, preferred_element_type=f32)
    n2 = relu(linear(featf, wn2, 5)).reshape(tb, n, hidden_size)
    out = (relu(g2) + n2) * inv_n

    out_ref[...] = out.astype(out_ref.dtype)
    attn_ref[...] = attn.astype(attn_ref.dtype)


def dicg_forward(x, params, *, n_agents, hidden_size, block_batch=None):
    """x: (bs, n_agents, sa_dim) float32. Returns (out, attention_weights)."""
    bs, n, sa_dim = x.shape
    assert n == n_agents
    f32 = jnp.float32

    # Batch block: amortize per-step pipeline overhead while keeping >= 2 grid
    # steps when possible (so both v7x TensorCores get work).
    if block_batch is None:
        block_batch = max(1, min(256, pl.cdiv(bs, 2)))
    tb = int(block_batch)

    n_blocks = pl.cdiv(bs, tb)
    bs_pad = n_blocks * tb
    if bs_pad != bs:
        x = jnp.pad(x, ((0, bs_pad - bs), (0, 0), (0, 0)))

    # Pack parameters: pre-transpose weights to (in_dim, out_dim) and bundle
    # them into 3 slabs (one DMA stream each instead of 13 tiny ones).
    wsa = jnp.stack([params['w1'].T, params['wg1'].T, params['wn1'].T]).astype(f32)
    wh = jnp.stack([params['w2'].T, params['wa'].T,
                    params['wg2'].T, params['wn2'].T]).astype(f32)
    b = jnp.stack([params['b1'], params['b2'], params['bg1'],
                   params['bn1'], params['bg2'], params['bn2']]).astype(f32)

    kernel = functools.partial(_dicg_kernel, n_agents, hidden_size)

    out, attn = pl.pallas_call(
        kernel,
        out_shape=(
            jax.ShapeDtypeStruct((bs_pad, n, hidden_size), f32),
            jax.ShapeDtypeStruct((bs_pad, n, n), f32),
        ),
        grid_spec=pltpu.PrefetchScalarGridSpec(
            num_scalar_prefetch=0,
            grid=(n_blocks,),
            in_specs=[
                pl.BlockSpec((tb, n, sa_dim), lambda i: (i, 0, 0)),
                pl.BlockSpec(wsa.shape, lambda i: (0, 0, 0)),
                pl.BlockSpec(wh.shape, lambda i: (0, 0, 0)),
                pl.BlockSpec(b.shape, lambda i: (0, 0)),
            ],
            out_specs=[
                pl.BlockSpec((tb, n, hidden_size), lambda i: (i, 0, 0)),
                pl.BlockSpec((tb, n, n), lambda i: (i, 0, 0)),
            ],
        ),
        compiler_params=pltpu.CompilerParams(
            dimension_semantics=("parallel",)),
    )(x, wsa, wh, b)

    return out[:bs], attn[:bs]


def init_params(key, sa_dim, hidden_size):
    """Deterministic synthetic parameters matching the PyTorch module shapes."""
    keys = jax.random.split(key, 13)
    s = 0.1
    f = jnp.float32

    def w(k, shape):
        return (s * jax.random.normal(k, shape)).astype(f)

    return {
        # encoder.linear1 / linear2  (PyTorch layout: W is (out_dim, in_dim))
        'w1': w(keys[0], (hidden_size, sa_dim)),
        'b1': w(keys[1], (hidden_size,)),
        'w2': w(keys[2], (hidden_size, hidden_size)),
        'b2': w(keys[3], (hidden_size,)),
        # attention_layer.linear_in (no bias)
        'wa': w(keys[4], (hidden_size, hidden_size)),
        # gc1.lin_layer / nn_gc1
        'wg1': w(keys[5], (hidden_size, sa_dim)),
        'bg1': w(keys[6], (hidden_size,)),
        'wn1': w(keys[7], (hidden_size, sa_dim)),
        'bn1': w(keys[8], (hidden_size,)),
        # gc2.lin_layer / nn_gc2
        'wg2': w(keys[9], (hidden_size, hidden_size)),
        'bg2': w(keys[10], (hidden_size,)),
        'wn2': w(keys[11], (hidden_size, hidden_size)),
        'bn2': w(keys[12], (hidden_size,)),
    }


def dicg_reference(x, p, n_agents):
    """Pure-JAX reference of the PyTorch forward, for a sanity check."""
    lin = lambda v, w, b=None: (v @ w.T + (b if b is not None else 0.0))
    relu = lambda v: jnp.maximum(v, 0.0)

    emb = relu(lin(relu(lin(x, p['w1'], p['b1'])), p['w2'], p['b2']))
    q = lin(emb, p['wa'])
    scores = jnp.einsum('bnk,bmk->bnm', q, emb)
    attn = jax.nn.softmax(scores, axis=-1)

    feat = relu(jnp.einsum('bnm,bmh->bnh', attn, lin(x, p['wg1'], p['bg1'])))
    feat = (feat + relu(lin(x, p['wn1'], p['bn1']))) / n_agents
    out = relu(jnp.einsum('bnm,bmh->bnh', attn, lin(feat, p['wg2'], p['bg2'])))
    out = (out + relu(lin(feat, p['wn2'], p['bn2']))) / n_agents
    return out, attn


if __name__ == "__main__":
    # SMALL demo shapes; bs=32 with TB=16 gives a 2-step parallel grid and a
    # flattened (TB*n_agents = 128)-row matmul slab per step.
    # TODO(synk): at truly tiny batch (e.g. bs=2) plain XLA beats any pallas_call;
    # use this kernel only when the batch axis is large.
    bs, n_agents, sa_dim, hidden_size = 32, 8, 16, 32

    key = jax.random.PRNGKey(0)
    k_x, k_p = jax.random.split(key)
    x = jax.random.normal(k_x, (bs, n_agents, sa_dim), dtype=jnp.float32)
    params = init_params(k_p, sa_dim, hidden_size)

    out, attn = dicg_forward(x, params, n_agents=n_agents,
                             hidden_size=hidden_size)
    out, attn = jax.block_until_ready((out, attn))

    out_ref, attn_ref = dicg_reference(x, params, n_agents)
    assert out.shape == (bs, n_agents, hidden_size)
    assert attn.shape == (bs, n_agents, n_agents)
    assert jnp.allclose(out, out_ref, atol=1e-4, rtol=1e-4)
    assert jnp.allclose(attn, attn_ref, atol=1e-4, rtol=1e-4)

    print("KERNEL_OK")
</pallas_src>

<mosaic_0001>
module attributes {stable_mosaic.version = 11 : i64} {
  func.func @_dicg_kernel(%arg0: i32, %arg1: memref<16x8x16xf32, #tpu.memory_space<vmem>>, %arg2: memref<3x16x32xf32, #tpu.memory_space<vmem>>, %arg3: memref<4x32x32xf32, #tpu.memory_space<vmem>>, %arg4: memref<6x32xf32, #tpu.memory_space<vmem>>, %arg5: memref<16x8x32xf32, #tpu.memory_space<vmem>>, %arg6: memref<16x8x8xf32, #tpu.memory_space<vmem>>) attributes {dimension_semantics = [#tpu.dimension_semantics<parallel>], iteration_bounds = array<i64: 2>, scalar_prefetch = 0 : i64, scratch_operands = 0 : i64, tpu.core_type = #tpu.core_type<tc>, window_params = [{transform_indices = @transform_0, window_bounds = array<i64: 16, 8, 16>}, {pipeline_mode = #tpu.pipeline_mode<synchronous>, transform_indices = @transform_1, window_bounds = array<i64: 3, 16, 32>}, {pipeline_mode = #tpu.pipeline_mode<synchronous>, transform_indices = @transform_2, window_bounds = array<i64: 4, 32, 32>}, {pipeline_mode = #tpu.pipeline_mode<synchronous>, transform_indices = @transform_3, window_bounds = array<i64: 6, 32>}, {transform_indices = @transform_4, window_bounds = array<i64: 16, 8, 32>}, {transform_indices = @transform_5, window_bounds = array<i64: 16, 8, 8>}]} {
    %c0 = arith.constant 0 : index
    %c0_0 = arith.constant 0 : index
    %c0_1 = arith.constant 0 : index
    %0 = vector.load %arg1[%c0, %c0_0, %c0_1] : memref<16x8x16xf32, #tpu.memory_space<vmem>>, vector<16x8x16xf32>
    %1 = vector.shape_cast %0 : vector<16x8x16xf32> to vector<128x16xf32>
    %c0_2 = arith.constant 0 : index
    %c0_3 = arith.constant 0 : index
    %c0_4 = arith.constant 0 : index
    %2 = vector.load %arg2[%c0_2, %c0_3, %c0_4] : memref<3x16x32xf32, #tpu.memory_space<vmem>>, vector<1x16x32xf32>
    %3 = vector.shape_cast %2 : vector<1x16x32xf32> to vector<16x32xf32>
    %c1 = arith.constant 1 : index
    %c0_5 = arith.constant 0 : index
    %c0_6 = arith.constant 0 : index
    %4 = vector.load %arg2[%c1, %c0_5, %c0_6] : memref<3x16x32xf32, #tpu.memory_space<vmem>>, vector<1x16x32xf32>
    %5 = vector.shape_cast %4 : vector<1x16x32xf32> to vector<16x32xf32>
    %c2 = arith.constant 2 : index
    %c0_7 = arith.constant 0 : index
    %c0_8 = arith.constant 0 : index
    %6 = vector.load %arg2[%c2, %c0_7, %c0_8] : memref<3x16x32xf32, #tpu.memory_space<vmem>>, vector<1x16x32xf32>
    %7 = vector.shape_cast %6 : vector<1x16x32xf32> to vector<16x32xf32>
    %c0_9 = arith.constant 0 : index
    %c0_10 = arith.constant 0 : index
    %c0_11 = arith.constant 0 : index
    %8 = vector.load %arg3[%c0_9, %c0_10, %c0_11] : memref<4x32x32xf32, #tpu.memory_space<vmem>>, vector<1x32x32xf32>
    %9 = vector.shape_cast %8 : vector<1x32x32xf32> to vector<32x32xf32>
    %c1_12 = arith.constant 1 : index
    %c0_13 = arith.constant 0 : index
    %c0_14 = arith.constant 0 : index
    %10 = vector.load %arg3[%c1_12, %c0_13, %c0_14] : memref<4x32x32xf32, #tpu.memory_space<vmem>>, vector<1x32x32xf32>
    %11 = vector.shape_cast %10 : vector<1x32x32xf32> to vector<32x32xf32>
    %c2_15 = arith.constant 2 : index
    %c0_16 = arith.constant 0 : index
    %c0_17 = arith.constant 0 : index
    %12 = vector.load %arg3[%c2_15, %c0_16, %c0_17] : memref<4x32x32xf32, #tpu.memory_space<vmem>>, vector<1x32x32xf32>
    %13 = vector.shape_cast %12 : vector<1x32x32xf32> to vector<32x32xf32>
    %c3 = arith.constant 3 : index
    %c0_18 = arith.constant 0 : index
    %c0_19 = arith.constant 0 : index
    %14 = vector.load %arg3[%c3, %c0_18, %c0_19] : memref<4x32x32xf32, #tpu.memory_space<vmem>>, vector<1x32x32xf32>
    %15 = vector.shape_cast %14 : vector<1x32x32xf32> to vector<32x32xf32>
    %cst = arith.constant dense<0.000000e+00> : vector<128x32xf32>
    %16 = tpu.matmul %1, %3, %cst {dimension_numbers = #tpu.dot_dimension_numbers<[1], [0], [0], [1], [0, 0, 1, 1], [], []>} : vector<128x16xf32>, vector<16x32xf32>, vector<128x32xf32> -> vector<128x32xf32>
    %c0_20 = arith.constant 0 : index
    %c0_21 = arith.constant 0 : index
    %17 = vector.load %arg4[%c0_20, %c0_21] : memref<6x32xf32, #tpu.memory_space<vmem>>, vector<1x32xf32>
    %18 = vector.broadcast %17 : vector<1x32xf32> to vector<128x32xf32>
    %19 = arith.addf %16, %18 : vector<128x32xf32>
    %cst_22 = arith.constant 0.000000e+00 : f32
    %20 = vector.broadcast %cst_22 : f32 to vector<128x32xf32>
    %21 = arith.maximumf %19, %20 : vector<128x32xf32>
    %cst_23 = arith.constant dense<0.000000e+00> : vector<128x32xf32>
    %22 = tpu.matmul %21, %9, %cst_23 {dimension_numbers = #tpu.dot_dimension_numbers<[1], [0], [0], [1], [0, 0, 1, 1], [], []>} : vector<128x32xf32>, vector<32x32xf32>, vector<128x32xf32> -> vector<128x32xf32>
    %c1_24 = arith.constant 1 : index
    %c0_25 = arith.constant 0 : index
    %23 = vector.load %arg4[%c1_24, %c0_25] : memref<6x32xf32, #tpu.memory_space<vmem>>, vector<1x32xf32>
    %24 = vector.broadcast %23 : vector<1x32xf32> to vector<128x32xf32>
    %25 = arith.addf %22, %24 : vector<128x32xf32>
    %cst_26 = arith.constant 0.000000e+00 : f32
    %26 = vector.broadcast %cst_26 : f32 to vector<128x32xf32>
    %27 = arith.maximumf %25, %26 : vector<128x32xf32>
    %cst_27 = arith.constant dense<0.000000e+00> : vector<128x32xf32>
    %28 = tpu.matmul %27, %11, %cst_27 {dimension_numbers = #tpu.dot_dimension_numbers<[1], [0], [0], [1], [0, 0, 1, 1], [], []>} : vector<128x32xf32>, vector<32x32xf32>, vector<128x32xf32> -> vector<128x32xf32>
    %29 = vector.shape_cast %27 : vector<128x32xf32> to vector<16x8x32xf32>
    %30 = vector.shape_cast %28 : vector<128x32xf32> to vector<16x8x32xf32>
    "tpu.trace_start"() <{level = 10 : i32, message = "bnk,bmk->bnm"}> : () -> ()
    %cst_28 = arith.constant dense<0.000000e+00> : vector<16x8x8xf32>
    %31 = tpu.matmul %30, %29, %cst_28 {dimension_numbers = #tpu.dot_dimension_numbers<[2], [2], [1], [1], [0, 0, 0, 1, 1, 1], [0], [0]>} : vector<16x8x32xf32>, vector<16x8x32xf32>, vector<16x8x8xf32> -> vector<16x8x8xf32>
    "tpu.trace_stop"() : () -> ()
    %cst_29 = arith.constant dense<0xFF800000> : vector<16x8xf32>
    %32 = vector.multi_reduction <maximumf>, %31, %cst_29 [2] : vector<16x8x8xf32> to vector<16x8xf32>
    %33 = vector.shape_cast %32 : vector<16x8xf32> to vector<16x8x1xf32>
    %34 = vector.broadcast %33 : vector<16x8x1xf32> to vector<16x8x8xf32>
    %35 = arith.subf %31, %34 : vector<16x8x8xf32>
    %36 = math.exp %35 : vector<16x8x8xf32>
    %cst_30 = arith.constant dense<0.000000e+00> : vector<16x8xf32>
    %37 = vector.multi_reduction <add>, %36, %cst_30 [2] : vector<16x8x8xf32> to vector<16x8xf32>
    %38 = vector.shape_cast %37 : vector<16x8xf32> to vector<16x8x1xf32>
    %39 = tpu.reciprocal %38 : vector<16x8x1xf32> -> vector<16x8x1xf32>
    %40 = vector.broadcast %39 : vector<16x8x1xf32> to vector<16x8x8xf32>
    %41 = arith.mulf %36, %40 : vector<16x8x8xf32>
    %cst_31 = arith.constant dense<0.000000e+00> : vector<128x32xf32>
    %42 = tpu.matmul %1, %5, %cst_31 {dimension_numbers = #tpu.dot_dimension_numbers<[1], [0], [0], [1], [0, 0, 1, 1], [], []>} : vector<128x16xf32>, vector<16x32xf32>, vector<128x32xf32> -> vector<128x32xf32>
    %c2_32 = arith.constant 2 : index
    %c0_33 = arith.constant 0 : index
    %43 = vector.load %arg4[%c2_32, %c0_33] : memref<6x32xf32, #tpu.memory_space<vmem>>, vector<1x32xf32>
    %44 = vector.broadcast %43 : vector<1x32xf32> to vector<128x32xf32>
    %45 = arith.addf %42, %44 : vector<128x32xf32>
    %46 = vector.shape_cast %45 : vector<128x32xf32> to vector<16x8x32xf32>
    "tpu.trace_start"() <{level = 10 : i32, message = "bnm,bmh->bnh"}> : () -> ()
    %cst_34 = arith.constant dense<0.000000e+00> : vector<16x8x32xf32>
    %47 = tpu.matmul %41, %46, %cst_34 {dimension_numbers = #tpu.dot_dimension_numbers<[2], [1], [1], [2], [0, 0, 0, 1, 1, 2], [0], [0]>} : vector<16x8x8xf32>, vector<16x8x32xf32>, vector<16x8x32xf32> -> vector<16x8x32xf32>
    "tpu.trace_stop"() : () -> ()
    %cst_35 = arith.constant dense<0.000000e+00> : vector<128x32xf32>
    %48 = tpu.matmul %1, %7, %cst_35 {dimension_numbers = #tpu.dot_dimension_numbers<[1], [0], [0], [1], [0, 0, 1, 1], [], []>} : vector<128x16xf32>, vector<16x32xf32>, vector<128x32xf32> -> vector<128x32xf32>
    %c3_36 = arith.constant 3 : index
    %c0_37 = arith.constant 0 : index
    %49 = vector.load %arg4[%c3_36, %c0_37] : memref<6x32xf32, #tpu.memory_space<vmem>>, vector<1x32xf32>
    %50 = vector.broadcast %49 : vector<1x32xf32> to vector<128x32xf32>
    %51 = arith.addf %48, %50 : vector<128x32xf32>
    %cst_38 = arith.constant 0.000000e+00 : f32
    %52 = vector.broadcast %cst_38 : f32 to vector<128x32xf32>
    %53 = arith.maximumf %51, %52 : vector<128x32xf32>
    %54 = vector.shape_cast %53 : vector<128x32xf32> to vector<16x8x32xf32>
    %cst_39 = arith.constant 0.000000e+00 : f32
    %55 = vector.broadcast %cst_39 : f32 to vector<16x8x32xf32>
    %56 = arith.maximumf %47, %55 : vector<16x8x32xf32>
    %57 = arith.addf %56, %54 : vector<16x8x32xf32>
    %cst_40 = arith.constant 1.250000e-01 : f32
    %58 = vector.broadcast %cst_40 : f32 to vector<16x8x32xf32>
    %59 = arith.mulf %57, %58 : vector<16x8x32xf32>
    %60 = vector.shape_cast %59 : vector<16x8x32xf32> to vector<128x32xf32>
    %cst_41 = arith.constant dense<0.000000e+00> : vector<128x32xf32>
    %61 = tpu.matmul %60, %13, %cst_41 {dimension_numbers = #tpu.dot_dimension_numbers<[1], [0], [0], [1], [0, 0, 1, 1], [], []>} : vector<128x32xf32>, vector<32x32xf32>, vector<128x32xf32> -> vector<128x32xf32>
    %c4 = arith.constant 4 : index
    %c0_42 = arith.constant 0 : index
    %62 = vector.load %arg4[%c4, %c0_42] : memref<6x32xf32, #tpu.memory_space<vmem>>, vector<1x32xf32>
    %63 = vector.broadcast %62 : vector<1x32xf32> to vector<128x32xf32>
    %64 = arith.addf %61, %63 : vector<128x32xf32>
    %65 = vector.shape_cast %64 : vector<128x32xf32> to vector<16x8x32xf32>
    "tpu.trace_start"() <{level = 10 : i32, message = "bnm,bmh->bnh"}> : () -> ()
    %cst_43 = arith.constant dense<0.000000e+00> : vector<16x8x32xf32>
    %66 = tpu.matmul %41, %65, %cst_43 {dimension_numbers = #tpu.dot_dimension_numbers<[2], [1], [1], [2], [0, 0, 0, 1, 1, 2], [0], [0]>} : vector<16x8x8xf32>, vector<16x8x32xf32>, vector<16x8x32xf32> -> vector<16x8x32xf32>
    "tpu.trace_stop"() : () -> ()
    %cst_44 = arith.constant dense<0.000000e+00> : vector<128x32xf32>
    %67 = tpu.matmul %60, %15, %cst_44 {dimension_numbers = #tpu.dot_dimension_numbers<[1], [0], [0], [1], [0, 0, 1, 1], [], []>} : vector<128x32xf32>, vector<32x32xf32>, vector<128x32xf32> -> vector<128x32xf32>
    %c5 = arith.constant 5 : index
    %c0_45 = arith.constant 0 : index
    %68 = vector.load %arg4[%c5, %c0_45] : memref<6x32xf32, #tpu.memory_space<vmem>>, vector<1x32xf32>
    %69 = vector.broadcast %68 : vector<1x32xf32> to vector<128x32xf32>
    %70 = arith.addf %67, %69 : vector<128x32xf32>
    %cst_46 = arith.constant 0.000000e+00 : f32
    %71 = vector.broadcast %cst_46 : f32 to vector<128x32xf32>
    %72 = arith.maximumf %70, %71 : vector<128x32xf32>
    %73 = vector.shape_cast %72 : vector<128x32xf32> to vector<16x8x32xf32>
    %cst_47 = arith.constant 0.000000e+00 : f32
    %74 = vector.broadcast %cst_47 : f32 to vector<16x8x32xf32>
    %75 = arith.maximumf %66, %74 : vector<16x8x32xf32>
    %76 = arith.addf %75, %73 : vector<16x8x32xf32>
    %cst_48 = arith.constant 1.250000e-01 : f32
    %77 = vector.broadcast %cst_48 : f32 to vector<16x8x32xf32>
    %78 = arith.mulf %76, %77 : vector<16x8x32xf32>
    %c0_49 = arith.constant 0 : index
    %c0_50 = arith.constant 0 : index
    %c0_51 = arith.constant 0 : index
    %79 = vector.load %arg5[%c0_49, %c0_50, %c0_51] : memref<16x8x32xf32, #tpu.memory_space<vmem>>, vector<16x8x32xf32>
    tpu.vector_store %arg5[%c0_49, %c0_50, %c0_51], %78 {strides = array<i32>} : memref<16x8x32xf32, #tpu.memory_space<vmem>>, vector<16x8x32xf32>,
    %c0_52 = arith.constant 0 : index
    %c0_53 = arith.constant 0 : index
    %c0_54 = arith.constant 0 : index
    %80 = vector.load %arg6[%c0_52, %c0_53, %c0_54] : memref<16x8x8xf32, #tpu.memory_space<vmem>>, vector<16x8x8xf32>
    tpu.vector_store %arg6[%c0_52, %c0_53, %c0_54], %41 {strides = array<i32>} : memref<16x8x8xf32, #tpu.memory_space<vmem>>, vector<16x8x8xf32>,
    return
  }
  func.func @transform_0(%arg0: i32) -> (i32, i32, i32) {
    %c0_i32 = arith.constant 0 : i32
    %c0_i32_0 = arith.constant 0 : i32
    %c0_i32_1 = arith.constant 0 : i32
    return %arg0, %c0_i32, %c0_i32_0 : i32, i32, i32
  }
  func.func @transform_1(%arg0: i32) -> (i32, i32, i32) {
    %c0_i32 = arith.constant 0 : i32
    %c0_i32_0 = arith.constant 0 : i32
    %c0_i32_1 = arith.constant 0 : i32
    %c0_i32_2 = arith.constant 0 : i32
    return %c0_i32, %c0_i32_0, %c0_i32_1 : i32, i32, i32
  }
  func.func @transform_2(%arg0: i32) -> (i32, i32, i32) {
    %c0_i32 = arith.constant 0 : i32
    %c0_i32_0 = arith.constant 0 : i32
    %c0_i32_1 = arith.constant 0 : i32
    %c0_i32_2 = arith.constant 0 : i32
    return %c0_i32, %c0_i32_0, %c0_i32_1 : i32, i32, i32
  }
  func.func @transform_3(%arg0: i32) -> (i32, i32) {
    %c0_i32 = arith.constant 0 : i32
    %c0_i32_0 = arith.constant 0 : i32
    %c0_i32_1 = arith.constant 0 : i32
    return %c0_i32, %c0_i32_0 : i32, i32
  }
  func.func @transform_4(%arg0: i32) -> (i32, i32, i32) {
    %c0_i32 = arith.constant 0 : i32
    %c0_i32_0 = arith.constant 0 : i32
    %c0_i32_1 = arith.constant 0 : i32
    return %arg0, %c0_i32, %c0_i32_0 : i32, i32, i32
  }
  func.func @transform_5(%arg0: i32) -> (i32, i32, i32) {
    %c0_i32 = arith.constant 0 : i32
    %c0_i32_0 = arith.constant 0 : i32
    %c0_i32_1 = arith.constant 0 : i32
    return %arg0, %c0_i32, %c0_i32_0 : i32, i32, i32
  }
}

</mosaic_0001>

<bundles_post_ra>
// kernel: tpu_custom_call.1
= control target key start
LH: loop header
LB: loop body
LE: loop exit
PB: predicated region body
PF: predicated region fallthrough
CT: control target
= control target key end

     0   :  { %11 = vsyncpa [#allocation3], 0  ;;  %s4100_s0 = inlined_call_operand.vmem [shape: f32[32,8,16], index: 0, kind: input, shape index: {}]   ;;  %s4101_s1 = inlined_call_operand.vmem [shape: f32[3,16,32], index: 1, kind: input, shape index: {}]   ;;  %s4102_s2 = inlined_call_operand.vmem [shape: f32[4,32,32], index: 2, kind: input, shape index: {}]   ;;  %s4103_s3 = inlined_call_operand.vmem [shape: f32[6,32], index: 3, kind: input, shape index: {}]   ;;  %s4104_s4 = inlined_call_operand.hbm [shape: f32[32,8,32], index: 4, kind: output, shape index: {0}]   ;;  %s4105_s5 = inlined_call_operand.vmem [shape: f32[32,8,8], index: 5, kind: output, shape index: {1}]  }
   0x1   :  { %13 = vsyncpa [#allocation3 + $0x1], 0  ;;  %s3126_s18 = smov 0   ;;  %s3128_s19 = smov 0  }
   0x2   :  { %s3130_s20 = smov 0   ;;  %s3132_s21 = smov 0  }
   0x3 LB: > { %s3147_s22 = sadd.s32 4294967295, %s3092_s21   ;;  %s2689_s23 = sadd.s32 4294967294, %s3092_s21   ;;  %s3092_s21 = sphi %s3132_s21, %s4111_s21   ;;  %s3088_s20 = sphi %s3130_s20, %s4110_s20   ;;  %s3084_s19 = sphi %s3128_s19, %s4109_s19   ;;  %s3080_s18 = sphi %s3126_s18, %s4108_s18  }
   0x4   : > { %s3151_s24 = sadd.s32 1, %s3092_s21   ;;  %s115_s25 = sadd.s32 1, %s3088_s20 }
   0x5   : > { %s112_s26 = ssub.s32 %s3092_s21, %s3151_s24  ;;  %p125_p0 = scmp.ne.s32.totalorder %s3088_s20, %s3084_s19 }
   0x6   : > { %p113_p1 = scmp.eq.s32.totalorder %s112_s26, 0  ;;  %p126_p2 = scmp.eq.s32.totalorder %s3147_s22, 1 }
   0x7   : > { %p131_p3 = scmp.ne.s32.totalorder %s3084_s19, %s3080_s18  ;;  %p132_p4 = scmp.eq.s32.totalorder %s2689_s23, 1 }
   0x8   : > { %s3162_s27 = scalar_select %p113_p1, %s3088_s20, %s115_s25  }
   0x9   : > { %p3164_p5 = por %p126_p2, %p125_p0  ;;  %p3168_p6 = por %p132_p4, %p131_p3 }
   0xa   : > { %p2692_p7 = scmp.ge.s32.totalorder %s3092_s21, 1  ;;  %p194_p8 = scmp.lt.s32.totalorder %s3092_s21, 3 }
   0xc   : > { %p195_p9 = pnand %p2692_p7, %p194_p8 }
   0xd   : > { %s2694_s9 = sshll.u32 (!%p195_p9), %s3147_s22, 4  ;;  %s217_s12 = sand.u32 (!%p195_p9), 1, %s3084_s19  }
   0xe   : > { %198 = sbr.rel (%p195_p9) target bundleno = 1639 (0x667), region = 36  ;;  %p228_p10 = scmp.lt.s32.totalorder (!%p195_p9), %s2694_s9, 31 }
   0xf   : > { %s2693_s14 = sshll.u32 (!%p195_p9), %s217_s12, 7  ;;  %s3050_s7 = scalar_lea.hbm (!%p195_p9), %s4104_s4, 256 }
  0x10   : > { %s4014_s15 = scalar_lea.vmem (!%p195_p9), [#allocation2], %s2693_s14 }
  0x11   : > { %s2595_s23 = sshll.u32 (!%p195_p9), %s4014_s15, 4  ;;  %s2596_s23 = int_to_ptr.vmem [resolvable:$true] %s2595_s23 }
  0x13   : > { %v257_v0 = vld [vmem:[%s4101_s1 + $0x8] sm:$0xff]  ;;  %v256_v1 = vld [vmem:[%s4101_s1] sm:$0xff]  ;;  %s4113_s9 = smov (!%p228_p10, %s2694_s9), 31  ;;  %vm285_vm0 = vcmask 130048   ;;  %v267_v6 = vld [vmem:[%s4102_s2 + $0x18] sm:$0xff]  ;;  %vm417_vm1 = vcmask 261120  }
  0x14   : > { %348 = vmatpush.msra.mxu0 %v257_v0  ;;  %2896 = vmatpush.msra.mxu1 %v257_v0  ;;  %s2695_s10 = sshll.u32 %s4113_s9, 3  ;;  %v266_v17 = vld [vmem:[%s4102_s2 + $0x10] sm:$0xff]  ;;  %v265_v18 = vld [vmem:[%s4102_s2 + $0x8] sm:$0xff]  ;;  %v264_v19 = vld [vmem:[%s4102_s2] sm:$0xff]  ;;  %vm1028_vm2 = vcmask 64512   ;;  %s2895_s9 = sshll.u32 %s3147_s22, 7 }
  0x15   : > { %2897 = vmatpush.msra.mxu2 %v257_v0  ;;  %2898 = vmatpush.msra.mxu3 %v257_v0  ;;  %s3189_s13 = scalar_lea.vmem %s4100_s0, %s2695_s10  ;;  %v3276_v20 = vld [vmem:[%s4103_s3] ss:$0 sm:$0xff]  ;;  %v2705_v53 = vld [vmem:[%s4102_s2 + $0x38] sm:$0xff]  ;;  %v2704_v61 = vld [vmem:[%s4102_s2 + $0x30] sm:$0xff]  ;;  %s3543_s16 = scalar_lea.vmem %s4105_s5, %s2695_s10 }
  0x16   : > { %349 = vmatpush.msra.mxu0 %v256_v1  ;;  %2899 = vmatpush.msra.mxu1 %v256_v1  ;;  %v3192_v2 = vld [vmem:[%s3189_s13] sm:$0xff]  ;;  %v3197_v3 = vld [vmem:[%s3189_s13 + $0x28] sm:$0xff]  ;;  %v3207_v5 = vld [vmem:[%s3189_s13 + $0x58] sm:$0xff]  ;;  %s2594_s17 = scalar_lea.hbm %s4104_s4, %s2895_s9  ;;  %s2578_s22 = scalar_lea.sflag [#allocation3], %s217_s12 }
  0x17   : > { %2900 = vmatpush.msra.mxu2 %v256_v1  ;;  %2901 = vmatpush.msra.mxu3 %v256_v1  ;;  %v3202_v4 = vld [vmem:[%s3189_s13 + $0x40] sm:$0xff]  ;;  %v3215_v7 = vld [vmem:[%s3189_s13 + $0x8] sm:$0xff]  ;;  %v3218_v8 = vld [vmem:[%s3189_s13 + $0x30] sm:$0xff] }
  0x18   : > { %2714 = vmatmul.msk.f32.vlgmr.msra.gmra.mxu0 %vm285_vm0, %v3192_v2  ;;  %2719 = vmatmul.msk.f32.vlgmr.msra.gmra.mxu1 %vm285_vm0, %v3197_v3  ;;  %v3221_v9 = vld [vmem:[%s3189_s13 + $0x48] sm:$0xff]  ;;  %v3226_v10 = vld [vmem:[%s3189_s13 + $0x60] sm:$0xff]  ;;  %v3235_v11 = vld [vmem:[%s3189_s13 + $0x10] sm:$0xff] }
  0x19   : > { %2722 = vmatmul.msk.f32.vlgmr.msra.gmra.mxu2 %vm285_vm0, %v3202_v4  ;;  %2725 = vmatmul.msk.f32.vlgmr.msra.gmra.mxu3 %vm285_vm0, %v3207_v5  ;;  %v3238_v12 = vld [vmem:[%s3189_s13 + $0x38] sm:$0xff]  ;;  %v3241_v13 = vld [vmem:[%s3189_s13 + $0x50] sm:$0xff]  ;;  %v3246_v14 = vld [vmem:[%s3189_s13 + $0x68] sm:$0xff] }
  0x1a   : > { %478 = vmatpush.msrb.mxu1 %v267_v6  ;;  %v3255_v15 = vld [vmem:[%s3189_s13 + $0x18] sm:$0xff]  ;;  %v3260_v16 = vld [vmem:[%s3189_s13 + $0x20] sm:$0xff]  ;;  %607 = vmatpush.msrb.mxu2 %v2705_v53  ;;  %v2703_v63 = vld [vmem:[%s4102_s2 + $0x28] sm:$0xff] }
  0x1b   : > { %v3313_v0 = vld [vmem:[%s3189_s13 + $0x70] sm:$0xff]  ;;  %v2702_v6 = vld [vmem:[%s4102_s2 + $0x20] sm:$0xff] }
  0x1c   : > { %479 = vmatpush.msrb.mxu1 %v266_v17  ;;  %608 = vmatpush.msrb.mxu2 %v2704_v61 }
  0x1e   : > { %480 = vmatpush.msrb.mxu1 %v265_v18  ;;  %609 = vmatpush.msrb.mxu2 %v2703_v63  ;;  %v3326_v18 = vld [vmem:[%s4103_s3 + $0x1] ss:$0 sm:$0xff] }
  0x20   : > { %2715 = vmatmul.msk.f32.gmra.mxu0 %vm285_vm0, %v3215_v7  ;;  %2720 = vmatmul.msk.f32.gmra.mxu1 %vm285_vm0, %v3218_v8 }
  0x21   : > { %2723 = vmatmul.msk.f32.gmra.mxu2 %vm285_vm0, %v3221_v9  ;;  %2726 = vmatmul.msk.f32.gmra.mxu3 %vm285_vm0, %v3226_v10 }
  0x22   : > { %481 = vmatpush.msrb.mxu1 %v264_v19  ;;  %610 = vmatpush.msrb.mxu2 %v2702_v6 }
  0x28   : > { %2716 = vmatmul.msk.f32.gmra.mxu0 %vm285_vm0, %v3235_v11  ;;  %2721 = vmatmul.msk.f32.gmra.mxu1 %vm285_vm0, %v3238_v12 }
  0x29   : > { %2724 = vmatmul.msk.f32.gmra.mxu2 %vm285_vm0, %v3241_v13  ;;  %2727 = vmatmul.msk.f32.gmra.mxu3 %vm285_vm0, %v3246_v14 }
  0x30   : > { %2717 = vmatmul.msk.f32.gmra.mxu0 %vm285_vm0, %v3255_v15 }
  0x31   : > { %2728 = vmatmul.msk.f32.gmra.mxu3 %vm285_vm0, %v3313_v0 }
  0x38   : > { %2718 = vmatmul.msk.f32.gmra.mxu0 %vm285_vm0, %v3260_v16 }
  0x95   : > { %v351_v21 = vpop.f32.mrf.mxu0  ;;  %v366_v33 = vpop.f32.mrf.mxu1 }
  0x96   : > { %v352_v22 = vadd.f32 %v3276_v20, %v351_v21  ;;  %v367_v37 = vadd.f32 %v3276_v20, %v366_v33 }
  0x98   : > { %v399_v23 = vmax.f32 %v352_v22, 0.0  ;;  %v404_v39 = vmax.f32 %v367_v37, 0.0 }
  0x9a   : > { %2730 = vmatmul.msk.f32.vlgmr.msrb.gmra.mxu1 %vm417_vm1, %v399_v23 }
  0x9c   : > { %v375_v44 = vpop.f32.mrf.mxu2  ;;  %v384_v54 = vpop.f32.mrf.mxu3 }
  0x9d   : > { %v354_v24 = vpop.f32.mrf.mxu0  ;;  %v369_v38 = vpop.f32.mrf.mxu1  ;;  %v376_v46 = vadd.f32 %v3276_v20, %v375_v44  ;;  %v385_v56 = vadd.f32 %v3276_v20, %v384_v54 }
  0x9e   : > { %v355_v25 = vadd.f32 %v3276_v20, %v354_v24  ;;  %v370_v40 = vadd.f32 %v3276_v20, %v369_v38 }
  0x9f   : > { %v407_v48 = vmax.f32 %v376_v46, 0.0  ;;  %v410_v58 = vmax.f32 %v385_v56, 0.0 }
  0xa0   : > { %v400_v26 = vmax.f32 %v355_v25, 0.0  ;;  %v405_v41 = vmax.f32 %v370_v40, 0.0 }
  0xa2   : > { %2731 = vmatmul.msk.f32.gmra.mxu1 %vm417_vm1, %v400_v26 }
  0xa4   : > { %v378_v47 = vpop.f32.mrf.mxu2  ;;  %v387_v57 = vpop.f32.mrf.mxu3 }
  0xa5   : > { %v357_v27 = vpop.f32.mrf.mxu0  ;;  %v372_v42 = vpop.f32.mrf.mxu1  ;;  %v379_v49 = vadd.f32 %v3276_v20, %v378_v47  ;;  %v388_v59 = vadd.f32 %v3276_v20, %v387_v57 }
  0xa6   : > { %v358_v28 = vadd.f32 %v3276_v20, %v357_v27  ;;  %v373_v43 = vadd.f32 %v3276_v20, %v372_v42 }
  0xa7   : > { %v408_v50 = vmax.f32 %v379_v49, 0.0  ;;  %v411_v60 = vmax.f32 %v388_v59, 0.0 }
  0xa8   : > { %v401_v29 = vmax.f32 %v358_v28, 0.0  ;;  %v406_v45 = vmax.f32 %v373_v43, 0.0 }
  0xaa   : > { %2732 = vmatmul.msk.f32.gmra.mxu1 %vm417_vm1, %v401_v29 }
  0xac   : > { %v381_v51 = vpop.f32.mrf.mxu2  ;;  %v390_v62 = vpop.f32.mrf.mxu3 }
  0xad   : > { %v360_v30 = vpop.f32.mrf.mxu0  ;;  %v382_v52 = vadd.f32 %v3276_v20, %v381_v51  ;;  %v391_v1 = vadd.f32 %v3276_v20, %v390_v62 }
  0xae   : > { %v361_v31 = vadd.f32 %v3276_v20, %v360_v30 }
  0xaf   : > { %v409_v55 = vmax.f32 %v382_v52, 0.0  ;;  %v412_v17 = vmax.f32 %v391_v1, 0.0 }
  0xb0   : > { %v402_v32 = vmax.f32 %v361_v31, 0.0 }
  0xb2   : > { %2733 = vmatmul.msk.f32.gmra.mxu1 %vm417_vm1, %v402_v32 }
  0xb5   : > { %v363_v34 = vpop.f32.mrf.mxu0 }
  0xb6   : > { %v364_v35 = vadd.f32 %v3276_v20, %v363_v34 }
  0xb8   : > { %v403_v36 = vmax.f32 %v364_v35, 0.0 }
  0xba   : > { %2734 = vmatmul.msk.f32.gmra.mxu1 %vm417_vm1, %v403_v36 }
  0xc2   : > { %2735 = vmatmul.msk.f32.gmra.mxu1 %vm417_vm1, %v404_v39 }
  0xca   : > { %2736 = vmatmul.msk.f32.gmra.mxu1 %vm417_vm1, %v405_v41 }
  0xd2   : > { %2737 = vmatmul.msk.f32.gmra.mxu1 %vm417_vm1, %v406_v45 }
  0xda   : > { %2738 = vmatmul.msk.f32.gmra.mxu1 %vm417_vm1, %v407_v48 }
  0xe2   : > { %2739 = vmatmul.msk.f32.gmra.mxu1 %vm417_vm1, %v408_v50  ;;  %v3351_v50 = vld [vmem:[%s3189_s13 + $0x78] sm:$0xff] }
  0xe3   : > { %2729 = vmatmul.msk.f32.gmra.mxu3 %vm285_vm0, %v3351_v50 }
  0xea   : > { %2740 = vmatmul.msk.f32.gmra.mxu1 %vm417_vm1, %v409_v55 }
  0xf2   : > { %2741 = vmatmul.msk.f32.gmra.mxu1 %vm417_vm1, %v410_v58 }
  0xfa   : > { %2742 = vmatmul.msk.f32.gmra.mxu1 %vm417_vm1, %v411_v60  ;;  %v393_v60 = vpop.f32.mrf.mxu3 }
  0xfb   : > { %v394_v61 = vadd.f32 %v3276_v20, %v393_v60  ;;  %v2699_v60 = vld [vmem:[%s4101_s1 + $0x18] sm:$0xff] }
  0xfc   : > { %1429 = vmatpush.msrb.mxu0 %v2699_v60 }
  0xfd   : > { %v413_v1 = vmax.f32 %v394_v61, 0.0  ;;  %v2698_v61 = vld [vmem:[%s4101_s1 + $0x10] sm:$0xff] }
  0xfe   : > { %1430 = vmatpush.msrb.mxu0 %v2698_v61 }
  0xff   : > { %2794 = vmatmul.msk.f32.vlgmr.msrb.gmra.mxu0 %vm285_vm0, %v3192_v2 }
 0x102   : > { %2743 = vmatmul.msk.f32.gmra.mxu1 %vm417_vm1, %v412_v17 }
 0x107   : > { %2795 = vmatmul.msk.f32.gmra.mxu0 %vm285_vm0, %v3215_v7 }
 0x10a   : > { %2744 = vmatmul.msk.f32.gmra.mxu1 %vm417_vm1, %v413_v1 }
 0x10f   : > { %2796 = vmatmul.msk.f32.gmra.mxu0 %vm285_vm0, %v3235_v11 }
 0x117   : > { %v483_v19 = vpop.f32.mrf.mxu1  ;;  %2797 = vmatmul.msk.f32.gmra.mxu0 %vm285_vm0, %v3255_v15 }
 0x118   : > { %v484_v21 = vadd.f32 %v3326_v18, %v483_v19 }
 0x11a   : > { %v531_v22 = vmax.f32 %v484_v21, 0.0 }
 0x11c   : > { %2746 = vmatmul.msk.f32.vlgmr.msrb.gmra.mxu2 %vm417_vm1, %v531_v22  ;;  %2762 = vmatpush.xpose.msk.msrb.mxu3 %vm417_vm1, %v531_v22 }
 0x11f   : > { %v486_v23 = vpop.f32.mrf.mxu1  ;;  %2798 = vmatmul.msk.f32.gmra.mxu0 %vm285_vm0, %v3260_v16 }
 0x120   : > { %v487_v24 = vadd.f32 %v3326_v18, %v486_v23 }
 0x122   : > { %v532_v25 = vmax.f32 %v487_v24, 0.0 }
 0x124   : > { %2747 = vmatmul.msk.f32.gmra.mxu2 %vm417_vm1, %v532_v25  ;;  %2764 = vmatpush.xpose.msk.msra.mxu3 %vm417_vm1, %v532_v25 }
 0x127   : > { %v489_v26 = vpop.f32.mrf.mxu1  ;;  %2799 = vmatmul.msk.f32.gmra.mxu0 %vm285_vm0, %v3197_v3 }
 0x128   : > { %v490_v27 = vadd.f32 %v3326_v18, %v489_v26 }
 0x12a   : > { %v533_v28 = vmax.f32 %v490_v27, 0.0 }
 0x12c   : > { %2748 = vmatmul.msk.f32.gmra.mxu2 %vm417_vm1, %v533_v28 }
 0x12f   : > { %v492_v29 = vpop.f32.mrf.mxu1  ;;  %2800 = vmatmul.msk.f32.gmra.mxu0 %vm285_vm0, %v3218_v8 }
 0x130   : > { %v493_v30 = vadd.f32 %v3326_v18, %v492_v29 }
 0x132   : > { %v534_v31 = vmax.f32 %v493_v30, 0.0 }
 0x134   : > { %2749 = vmatmul.msk.f32.gmra.mxu2 %vm417_vm1, %v534_v31 }
 0x137   : > { %v495_v32 = vpop.f32.mrf.mxu1  ;;  %2801 = vmatmul.msk.f32.gmra.mxu0 %vm285_vm0, %v3238_v12 }
 0x138   : > { %v496_v33 = vadd.f32 %v3326_v18, %v495_v32 }
 0x13a   : > { %v535_v34 = vmax.f32 %v496_v33, 0.0 }
 0x13c   : > { %2750 = vmatmul.msk.f32.gmra.mxu2 %vm417_vm1, %v535_v34 }
 0x13f   : > { %v498_v35 = vpop.f32.mrf.mxu1  ;;  %2802 = vmatmul.msk.f32.gmra.mxu0 %vm285_vm0, %v3202_v4 }
 0x140   : > { %v499_v36 = vadd.f32 %v3326_v18, %v498_v35 }
 0x142   : > { %v536_v37 = vmax.f32 %v499_v36, 0.0 }
 0x144   : > { %2751 = vmatmul.msk.f32.gmra.mxu2 %vm417_vm1, %v536_v37 }
 0x147   : > { %v501_v38 = vpop.f32.mrf.mxu1  ;;  %2803 = vmatmul.msk.f32.gmra.mxu0 %vm285_vm0, %v3221_v9 }
 0x148   : > { %v502_v39 = vadd.f32 %v3326_v18, %v501_v38 }
 0x14a   : > { %v537_v40 = vmax.f32 %v502_v39, 0.0 }
 0x14c   : > { %2752 = vmatmul.msk.f32.gmra.mxu2 %vm417_vm1, %v537_v40 }
 0x14f   : > { %v504_v41 = vpop.f32.mrf.mxu1  ;;  %2804 = vmatmul.msk.f32.gmra.mxu0 %vm285_vm0, %v3241_v13 }
 0x150   : > { %v505_v42 = vadd.f32 %v3326_v18, %v504_v41 }
 0x152   : > { %v538_v43 = vmax.f32 %v505_v42, 0.0 }
 0x154   : > { %2753 = vmatmul.msk.f32.gmra.mxu2 %vm417_vm1, %v538_v43 }
 0x157   : > { %v507_v44 = vpop.f32.mrf.mxu1  ;;  %2805 = vmatmul.msk.f32.gmra.mxu0 %vm285_vm0, %v3207_v5 }
 0x158   : > { %v508_v45 = vadd.f32 %v3326_v18, %v507_v44 }
 0x15a   : > { %v539_v46 = vmax.f32 %v508_v45, 0.0 }
 0x15c   : > { %2754 = vmatmul.msk.f32.gmra.mxu2 %vm417_vm1, %v539_v46 }
 0x15f   : > { %v510_v47 = vpop.f32.mrf.mxu1  ;;  %2806 = vmatmul.msk.f32.gmra.mxu0 %vm285_vm0, %v3226_v10 }
 0x160   : > { %v511_v48 = vadd.f32 %v3326_v18, %v510_v47 }
 0x162   : > { %v540_v49 = vmax.f32 %v511_v48, 0.0 }
 0x164   : > { %2755 = vmatmul.msk.f32.gmra.mxu2 %vm417_vm1, %v540_v49 }
 0x166   : > { %v396_v29 = vpop.f32.mrf.mxu3 }
 0x167   : > { %v513_v51 = vpop.f32.mrf.mxu1  ;;  %v397_v30 = vadd.f32 %v3276_v20, %v396_v29  ;;  %2807 = vmatmul.msk.f32.gmra.mxu0 %vm285_vm0, %v3246_v14 }
 0x168   : > { %v514_v52 = vadd.f32 %v3326_v18, %v513_v51 }
 0x16a   : > { %v541_v53 = vmax.f32 %v514_v52, 0.0 }
 0x16c   : > { %2756 = vmatmul.msk.f32.gmra.mxu2 %vm417_vm1, %v541_v53 }
 0x16f   : > { %v516_v54 = vpop.f32.mrf.mxu1  ;;  %2808 = vmatmul.msk.f32.gmra.mxu0 %vm285_vm0, %v3313_v0 }
 0x170   : > { %v517_v55 = vadd.f32 %v3326_v18, %v516_v54 }
 0x172   : > { %v542_v56 = vmax.f32 %v517_v55, 0.0 }
 0x174   : > { %2757 = vmatmul.msk.f32.gmra.mxu2 %vm417_vm1, %v542_v56 }
 0x177   : > { %v519_v57 = vpop.f32.mrf.mxu1  ;;  %2809 = vmatmul.msk.f32.gmra.mxu0 %vm285_vm0, %v3351_v50  ;;  %v3503_v50 = vld [vmem:[%s4103_s3 + $0x2] ss:$0 sm:$0xff] }
 0x178   : > { %v520_v58 = vadd.f32 %v3326_v18, %v519_v57 }
 0x17a   : > { %v543_v59 = vmax.f32 %v520_v58, 0.0 }
 0x17c   : > { %2758 = vmatmul.msk.f32.gmra.mxu2 %vm417_vm1, %v543_v59 }
 0x17f   : > { %v522_v62 = vpop.f32.mrf.mxu1 }
 0x180   : > { %v523_v63 = vadd.f32 %v3326_v18, %v522_v62 }
 0x182   : > { %v544_v6 = vmax.f32 %v523_v63, 0.0 }
 0x184   : > { %2759 = vmatmul.msk.f32.gmra.mxu2 %vm417_vm1, %v544_v6 }
 0x187   : > { %v525_v35 = vpop.f32.mrf.mxu1 }
 0x188   : > { %v526_v36 = vadd.f32 %v3326_v18, %v525_v35 }
 0x18a   : > { %v545_v20 = vmax.f32 %v526_v36, 0.0 }
 0x18c   : > { %2760 = vmatmul.msk.f32.gmra.mxu2 %vm417_vm1, %v545_v20 }
 0x19f   : > { %v612_v17 = vpop.f32.mrf.mxu2 }
 0x1a0   : > { %2763 = vmatmul.msk.f32.vlgmr.msrb.gmra.mxu3 %vm417_vm1, %v612_v17 }
 0x1a1   : > { %2766 = vmatpush.xpose.msk.msrb.mxu3 %vm417_vm1, %v533_v28 }
 0x1a7   : > { %v615_v19 = vpop.f32.mrf.mxu2 }
 0x1a8   : > { %2765 = vmatmul.msk.f32.vlgmr.msra.gmra.mxu3 %vm417_vm1, %v615_v19 }
 0x1a9   : > { %2768 = vmatpush.xpose.msk.msra.mxu3 %vm417_vm1, %v534_v31  ;;  %v414_v31 = vmax.f32 %v397_v30, 0.0 }
 0x1ab   : > { %2745 = vmatmul.msk.f32.gmra.mxu1 %vm417_vm1, %v414_v31 }
 0x1af   : > { %v618_v21 = vpop.f32.mrf.mxu2 }
 0x1b0   : > { %2767 = vmatmul.msk.f32.vlgmr.msrb.gmra.mxu3 %vm417_vm1, %v618_v21 }
 0x1b1   : > { %2770 = vmatpush.xpose.msk.msrb.mxu3 %vm417_vm1, %v535_v34 }
 0x1b7   : > { %v621_v22 = vpop.f32.mrf.mxu2 }
 0x1b8   : > { %2769 = vmatmul.msk.f32.vlgmr.msra.gmra.mxu3 %vm417_vm1, %v621_v22 }
 0x1b9   : > { %2772 = vmatpush.xpose.msk.msra.mxu3 %vm417_vm1, %v536_v37 }
 0x1bf   : > { %v624_v23 = vpop.f32.mrf.mxu2 }
 0x1c0   : > { %2771 = vmatmul.msk.f32.vlgmr.msrb.gmra.mxu3 %vm417_vm1, %v624_v23 }
 0x1c1   : > { %2774 = vmatpush.xpose.msk.msrb.mxu3 %vm417_vm1, %v537_v40 }
 0x1c7   : > { %v627_v24 = vpop.f32.mrf.mxu2 }
 0x1c8   : > { %2773 = vmatmul.msk.f32.vlgmr.msra.gmra.mxu3 %vm417_vm1, %v627_v24 }
 0x1c9   : > { %2776 = vmatpush.xpose.msk.msra.mxu3 %vm417_vm1, %v538_v43 }
 0x1cf   : > { %v630_v25 = vpop.f32.mrf.mxu2 }
 0x1d0   : > { %2775 = vmatmul.msk.f32.vlgmr.msrb.gmra.mxu3 %vm417_vm1, %v630_v25 }
 0x1d1   : > { %2778 = vmatpush.xpose.msk.msrb.mxu3 %vm417_vm1, %v539_v46 }
 0x1d7   : > { %v633_v26 = vpop.f32.mrf.mxu2 }
 0x1d8   : > { %2777 = vmatmul.msk.f32.vlgmr.msra.gmra.mxu3 %vm417_vm1, %v633_v26 }
 0x1d9   : > { %2780 = vmatpush.xpose.msk.msra.mxu3 %vm417_vm1, %v540_v49 }
 0x1df   : > { %v636_v27 = vpop.f32.mrf.mxu2 }
 0x1e0   : > { %2779 = vmatmul.msk.f32.vlgmr.msrb.gmra.mxu3 %vm417_vm1, %v636_v27 }
 0x1e1   : > { %2782 = vmatpush.xpose.msk.msrb.mxu3 %vm417_vm1, %v541_v53 }
 0x1e7   : > { %v639_v28 = vpop.f32.mrf.mxu2 }
 0x1e8   : > { %2781 = vmatmul.msk.f32.vlgmr.msra.gmra.mxu3 %vm417_vm1, %v639_v28 }
 0x1e9   : > { %2784 = vmatpush.xpose.msk.msra.mxu3 %vm417_vm1, %v542_v56 }
 0x1ef   : > { %v642_v32 = vpop.f32.mrf.mxu2 }
 0x1f0   : > { %2783 = vmatmul.msk.f32.vlgmr.msrb.gmra.mxu3 %vm417_vm1, %v642_v32 }
 0x1f1   : > { %2786 = vmatpush.xpose.msk.msrb.mxu3 %vm417_vm1, %v543_v59 }
 0x1f7   : > { %v645_v33 = vpop.f32.mrf.mxu2 }
 0x1f8   : > { %2785 = vmatmul.msk.f32.vlgmr.msra.gmra.mxu3 %vm417_vm1, %v645_v33 }
 0x1f9   : > { %2788 = vmatpush.xpose.msk.msra.mxu3 %vm417_vm1, %v544_v6 }
 0x1ff   : > { %v648_v34 = vpop.f32.mrf.mxu2 }
 0x200   : > { %2787 = vmatmul.msk.f32.vlgmr.msrb.gmra.mxu3 %vm417_vm1, %v648_v34 }
 0x201   : > { %2790 = vmatpush.xpose.msk.msrb.mxu3 %vm417_vm1, %v545_v20  ;;  %v1432_v20 = vpop.f32.mrf.mxu0 }
 0x207   : > { %v651_v37 = vpop.f32.mrf.mxu2 }
 0x208   : > { %2789 = vmatmul.msk.f32.vlgmr.msra.gmra.mxu3 %vm417_vm1, %v651_v37 }
 0x20f   : > { %v654_v62 = vpop.f32.mrf.mxu2 }
 0x210   : > { %2791 = vmatmul.msk.f32.vlgmr.msrb.gmra.mxu3 %vm417_vm1, %v654_v62 }
 0x223   : > { %v3396_v38 = vpop.f32.mrf.mxu3 }
 0x224   : > { %v1029_v1 = vsel %vm1028_vm2, %v3396_v38, -inf }
 0x228   : > { %v528_v55 = vpop.f32.mrf.mxu1 }
 0x229   : > { %v529_v56 = vadd.f32 %v3326_v18, %v528_v55 }
 0x22b   : > { %v703_v39 = vpop.f32.mrf.mxu3  ;;  %v546_v57 = vmax.f32 %v529_v56, 0.0 }
 0x22c   : > { %v1032_v40 = vsel %vm1028_vm2, %v703_v39, -inf }
 0x22d   : > { %1033 = vmax.xlane.f32.xlu0 %v1032_v40  ;;  %2761 = vmatmul.msk.f32.gmra.mxu2 %vm417_vm1, %v546_v57 }
 0x22e   : > { %2792 = vmatpush.xpose.msk.msra.mxu3 %vm417_vm1, %v546_v57 }
 0x233   : > { %v3399_v41 = vpop.f32.mrf.mxu3 }
 0x234   : > { %v1035_v46 = vsel %vm1028_vm2, %v3399_v41, -inf }
 0x23b   : > { %v3401_v42 = vpop.f32.mrf.mxu3 }
 0x23c   : > { %v1038_v6 = vsel %vm1028_vm2, %v3401_v42, -inf }
 0x243   : > { %v772_v43 = vpop.f32.mrf.mxu3 }
 0x244   : > { %v1041_v44 = vsel %vm1028_vm2, %v772_v43, -inf }
 0x245   : > { %1042 = vmax.xlane.f32.xlu0 %v1041_v44  ;;  %v1433_v44 = vadd.f32 %v3503_v50, %v1432_v20 }
 0x247   : > { %1498 = vmatpush.msrb.mxu3 %v1433_v44 }
 0x24b   : > { %v3404_v45 = vpop.f32.mrf.mxu3 }
 0x24c   : > { %v1044_v7 = vsel %vm1028_vm2, %v3404_v45, -inf }
 0x24d   : > { %1036 = vmax.xlane.f32.xlu0 %v1035_v46 }
 0x253   : > { %v3408_v47 = vpop.f32.mrf.mxu3 }
 0x254   : > { %v1047_v4 = vsel %vm1028_vm2, %v3408_v47, -inf }
 0x25b   : > { %v841_v48 = vpop.f32.mrf.mxu3 }
 0x25c   : > { %v1050_v49 = vsel %vm1028_vm2, %v841_v48, -inf }
 0x25d   : > { %1051 = vmax.xlane.f32.xlu1 %v1050_v49 }
 0x263   : > { %v3411_v51 = vpop.f32.mrf.mxu3 }
 0x264   : > { %v1053_v28 = vsel %vm1028_vm2, %v3411_v51, -inf }
 0x26b   : > { %v3413_v52 = vpop.f32.mrf.mxu3 }
 0x273   : > { %v3415_v53 = vpop.f32.mrf.mxu3 }
 0x274   : > { %v1059_v54 = vsel %vm1028_vm2, %v3415_v53, -inf }
 0x275   : > { %1060 = vmax.xlane.f32.xlu1 %v1059_v54 }
 0x27b   : > { %v3422_v58 = vpop.f32.mrf.mxu3 }
 0x27c   : > { %v1062_v62 = vsel %vm1028_vm2, %v3422_v58, -inf }
 0x283   : > { %v3424_v59 = vpop.f32.mrf.mxu3 }
 0x28b   : > { %v979_v18 = vpop.f32.mrf.mxu3 }
 0x28c   : > { %v1068_v63 = vsel %vm1028_vm2, %v979_v18, -inf }
 0x28d   : > { %1069 = vmax.xlane.f32.xlu2 %v1068_v63 }
 0x295   : > { %1030 = vmax.xlane.f32.xlu2 %v1029_v1 }
 0x29d   : > { %1039 = vmax.xlane.f32.xlu2 %v1038_v6 }
 0x2a0   : > { %v1034_v17 = vpop.xlane.xlu0 %1033 }
 0x2a1   : > { %v1078_v2 = vsub.f32 %v703_v39, %v1034_v17 }
 0x2a3   : > { %v1095_v19 = vmul.f32 1.442695, %v1078_v2  ;;  %v1065_v2 = vsel %vm1028_vm2, %v3424_v59, -inf }
 0x2a5   : > { %2949 = vpow2.f32 %v1095_v19  ;;  %1045 = vmax.xlane.f32.xlu2 %v1044_v7  ;;  %v3532_v7 = vpop.f32.mrf.mxu3 }
 0x2ab   : > { %v3450_v21 = vpop.eup %2949 }
 0x2ac   : > { %v1128_v11 = vsel %vm1028_vm2, %v3450_v21, 0.0 }
 0x2ad   : > { %1129 = vadd.xlane.f32.xlu1 %v1128_v11 }
 0x2b0   : > { %v657_v30 = vpop.f32.mrf.mxu2 }
 0x2b1   : > { %2793 = vmatmul.msk.f32.vlgmr.msra.gmra.mxu3 %vm417_vm1, %v657_v30 }
 0x2b8   : > { %v1043_v22 = vpop.xlane.xlu0 %1042 }
 0x2b9   : > { %v1081_v15 = vsub.f32 %v772_v43, %v1043_v22  ;;  %v1435_v43 = vpop.f32.mrf.mxu0 }
 0x2ba   : > { %v1436_v46 = vadd.f32 %v3503_v50, %v1435_v43 }
 0x2bb   : > { %v1101_v23 = vmul.f32 1.442695, %v1081_v15 }
 0x2bc   : > { %1521 = vmatpush.msra.mxu1 %v1436_v46 }
 0x2bd   : > { %2951 = vpow2.f32 %v1101_v23 }
 0x2c0   : > { %v1037_v10 = vpop.xlane.xlu0 %1036 }
 0x2c1   : > { %v1079_v14 = vsub.f32 %v3399_v41, %v1037_v10  ;;  %v1438_v56 = vpop.f32.mrf.mxu0 }
 0x2c2   : > { %v1439_v57 = vadd.f32 %v3503_v50, %v1438_v56 }
 0x2c3   : > { %v3460_v16 = vpop.eup %2951  ;;  %v1097_v34 = vmul.f32 1.442695, %v1079_v14 }
 0x2c4   : > { %v1137_v24 = vsel %vm1028_vm2, %v3460_v16, 0.0  ;;  %1544 = vmatpush.msra.mxu2 %v1439_v57 }
 0x2c5   : > { %1138 = vadd.xlane.f32.xlu0 %v1137_v24  ;;  %v1071_v24 = vsel %vm1028_vm2, %v3532_v7, -inf }
 0x2c9   : > { %v1441_v1 = vpop.f32.mrf.mxu0 }
 0x2ca   : > { %v1442_v22 = vadd.f32 %v3503_v50, %v1441_v1 }
 0x2cc   : > { %1567 = vmatpush.msra.mxu3 %v1442_v22 }
 0x2d0   : > { %v1052_v3 = vpop.xlane.xlu1 %1051 }
 0x2d1   : > { %v1084_v25 = vsub.f32 %v841_v48, %v1052_v3  ;;  %v1444_v15 = vpop.f32.mrf.mxu0 }
 0x2d2   : > { %v1445_v3 = vadd.f32 %v3503_v50, %v1444_v15 }
 0x2d3   : > { %v1107_v8 = vmul.f32 1.442695, %v1084_v25 }
 0x2d4   : > { %1590 = vmatpush.msrb.mxu1 %v1445_v3 }
 0x2d5   : > { %2953 = vpow2.f32 %v1107_v8 }
 0x2db   : > { %v3470_v12 = vpop.eup %2953 }
 0x2dc   : > { %v1146_v26 = vsel %vm1028_vm2, %v3470_v12, 0.0 }
 0x2dd   : > { %1147 = vadd.xlane.f32.xlu1 %v1146_v26 }
 0x2e5   : > { %1048 = vmax.xlane.f32.xlu1 %v1047_v4 }
 0x2e8   : > { %v1061_v27 = vpop.xlane.xlu1 %1060 }
 0x2e9   : > { %v1087_v9 = vsub.f32 %v3415_v53, %v1061_v27 }
 0x2eb   : > { %v1113_v13 = vmul.f32 1.442695, %v1087_v9 }
 0x2ed   : > { %2955 = vpow2.f32 %v1113_v13  ;;  %1054 = vmax.xlane.f32.xlu1 %v1053_v28  ;;  %v1447_v28 = vpop.f32.mrf.mxu0 }
 0x2ee   : > { %v1448_v30 = vadd.f32 %v3503_v50, %v1447_v28 }
 0x2f0   : > { %1613 = vmatpush.msrb.mxu2 %v1448_v30 }
 0x2f3   : > { %v3485_v5 = vpop.eup %2955 }
 0x2f4   : > { %v1155_v29 = vsel %vm1028_vm2, %v3485_v5, 0.0 }
 0x2f5   : > { %1156 = vadd.xlane.f32.xlu0 %v1155_v29 }
 0x300   : > { %v1070_v31 = vpop.xlane.xlu2 %1069 }
 0x301   : > { %v1090_v32 = vsub.f32 %v979_v18, %v1070_v31  ;;  %v1056_v18 = vsel %vm1028_vm2, %v3413_v52, -inf  ;;  %v3554_v31 = vpop.f32.mrf.mxu0 }
 0x303   : > { %v1119_v33 = vmul.f32 1.442695, %v1090_v32 }
 0x305   : > { %2957 = vpow2.f32 %v1119_v33 }
 0x306   : > { %2959 = vpow2.f32 %v1097_v34 }
 0x308   : > { %v1031_v35 = vpop.xlane.xlu2 %1030 }
 0x309   : > { %v1077_v36 = vsub.f32 %v3396_v38, %v1031_v35  ;;  %v1453_v33 = vpop.f32.mrf.mxu0 }
 0x30b   : > { %v3496_v37 = vpop.eup %2957  ;;  %v1093_v0 = vmul.f32 1.442695, %v1077_v36 }
 0x30c   : > { %v1164_v39 = vsel %vm1028_vm2, %v3496_v37, 0.0  ;;  %v3505_v41 = vpop.eup %2959 }
 0x30d   : > { %2961 = vpow2.f32 %v1093_v0  ;;  %1165 = vadd.xlane.f32.xlu2 %v1164_v39  ;;  %v1131_v53 = vsel %vm1028_vm2, %v3505_v41, 0.0 }
 0x310   : > { %v1040_v40 = vpop.xlane.xlu2 %1039 }
 0x311   : > { %v1080_v38 = vsub.f32 %v3401_v42, %v1040_v40  ;;  %v3557_v43 = vpop.f32.mrf.mxu0 }
 0x313   : > { %v3510_v48 = vpop.eup %2961  ;;  %v1099_v49 = vmul.f32 1.442695, %v1080_v38 }
 0x314   : > { %v1125_v54 = vsel %vm1028_vm2, %v3510_v48, 0.0 }
 0x315   : > { %2963 = vpow2.f32 %v1099_v49  ;;  %1132 = vadd.xlane.f32.xlu2 %v1131_v53  ;;  %1126 = vadd.xlane.f32.xlu0 %v1125_v54 }
 0x318   : > { %v1046_v42 = vpop.xlane.xlu2 %1045 }
 0x319   : > { %v1082_v55 = vsub.f32 %v3404_v45, %v1046_v42  ;;  %v3567_v49 = vpop.f32.mrf.mxu0 }
 0x31b   : > { %v3518_v60 = vpop.eup %2963  ;;  %v1103_v61 = vmul.f32 1.442695, %v1082_v55 }
 0x31c   : > { %v1134_v63 = vsel %vm1028_vm2, %v3518_v60, 0.0 }
 0x31d   : > { %2965 = vpow2.f32 %v1103_v61  ;;  %1063 = vmax.xlane.f32.xlu2 %v1062_v62  ;;  %1057 = vmax.xlane.f32.xlu0 %v1056_v18 }
 0x31e   : > { %1135 = vadd.xlane.f32.xlu1 %v1134_v63 }
 0x320   : > { %v1130_v45 = vpop.xlane.xlu1 %1129 }
 0x321   : > { %2967 = vrcp.f32 %v1130_v45  ;;  %v1198_v25 = vand.u32 2147483648, %v1130_v45  ;;  %v1196_v26 = vand.u32 2147483647, %v1130_v45  ;;  %vm1192_vm4 = vweird.f32 %v1130_v45  ;;  %v1462_v56 = vpop.f32.mrf.mxu0 }
 0x323   : > { %v3526_v6 = vpop.eup %2965  ;;  %v1199_v27 = vor.u32 1.1754944e-38, %v1198_v25  ;;  %vm1197_vm6 = vcmp.eq.f32.partialorder %v1196_v26, 8.507059e+37 }
 0x324   : > { %v1140_v17 = vsel %vm1028_vm2, %v3526_v6, 0.0 }
 0x325   : > { %1141 = vadd.xlane.f32.xlu0 %v1140_v17 }
 0x326   : > { %1066 = vmax.xlane.f32.xlu1 %v1065_v2 }
 0x327   : > { %v2968_v19 = vpop.eup %2967 }
 0x328   : > { %v1188_v11 = vmul.f32 %v2968_v19, %v1130_v45  ;;  %vm1193_vm3 = vweird.f32 %v2968_v19 }
 0x329   : > { %vm1194_vm5 = vmor %vm1192_vm4, %vm1193_vm3 }
 0x32a   : > { %v1189_v23 = vsub.f32 1.0, %v1188_v11  ;;  %v3572_v11 = vpop.f32.mrf.mxu0 }
 0x32c   : > { %v1190_v8 = vmul.f32 %v2968_v19, %v1189_v23 }
 0x32d   : > { %1072 = vmax.xlane.f32.xlu0 %v1071_v24 }
 0x32e   : > { %v1191_v4 = vadd.f32 %v2968_v19, %v1190_v8 }
 0x330   : > { %v1195_v9 = vsel %vm1194_vm5, %v2968_v19, %v1191_v4 }
 0x331   : > { %v1200_v13 = vsel %vm1197_vm6, %v1199_v27, %v1195_v9 }
 0x332   : > { %v3546_v29 = vmul.f32 %v3450_v21, %v1200_v13  ;;  %v1454_v21 = vadd.f32 %v3503_v50, %v1453_v33  ;;  %v3586_v3 = vpop.f32.mrf.mxu0 }
 0x334   : > { %2811 = vmatmul.msk.f32.vlgmr.msra.gmra.mxu1 %vm1028_vm2, %v3546_v29  ;;  %2562 = vst.msk [vmem:[%s3543_s16 + $0x8] sm:$0xff] %vm1028_vm2, %v3546_v29 }
 0x335   : > { %1659 = vmatpush.msra.mxu1 %v1454_v21  ;;  %v2701_v21 = vld [vmem:[%s4101_s1 + $0x28] sm:$0xff] }
 0x338   : > { %v1139_v10 = vpop.xlane.xlu0 %1138 }
 0x339   : > { %2969 = vrcp.f32 %v1139_v10  ;;  %v1240_v35 = vand.u32 2147483648, %v1139_v10  ;;  %v1238_v20 = vand.u32 2147483647, %v1139_v10  ;;  %vm1234_vm8 = vweird.f32 %v1139_v10 }
 0x33a   : > { %v1471_v27 = vpop.f32.mrf.mxu0 }
 0x33b   : > { %v1241_v39 = vor.u32 1.1754944e-38, %v1240_v35  ;;  %vm1239_vm10 = vcmp.eq.f32.partialorder %v1238_v20, 8.507059e+37  ;;  %v1472_v13 = vadd.f32 %v3503_v50, %v1471_v27  ;;  %v2700_v35 = vld [vmem:[%s4101_s1 + $0x20] sm:$0xff] }
 0x33f   : > { %v2970_v32 = vpop.eup %2969 }
 0x340   : > { %v1230_v14 = vmul.f32 %v2970_v32, %v1139_v10  ;;  %vm1235_vm7 = vweird.f32 %v2970_v32 }
 0x341   : > { %vm1236_vm9 = vmor %vm1234_vm8, %vm1235_vm7 }
 0x342   : > { %v1231_v34 = vsub.f32 1.0, %v1230_v14 }
 0x344   : > { %v1232_v36 = vmul.f32 %v2970_v32, %v1231_v34 }
 0x346   : > { %v1233_v0 = vadd.f32 %v2970_v32, %v1232_v36 }
 0x348   : > { %v1237_v40 = vsel %vm1236_vm9, %v2970_v32, %v1233_v0 }
 0x349   : > { %v1242_v38 = vsel %vm1239_vm10, %v1241_v39, %v1237_v40 }
 0x34a   : > { %v3560_v44 = vmul.f32 %v3460_v16, %v1242_v38  ;;  %v1463_v16 = vadd.f32 %v3503_v50, %v1462_v56 }
 0x34c   : > { %2814 = vmatmul.msk.f32.vlgmr.msrb.gmra.mxu1 %vm1028_vm2, %v3560_v44  ;;  %2565 = vst.msk [vmem:[%s3543_s16 + $0x20] sm:$0xff] %vm1028_vm2, %v3560_v44 }
 0x34d   : > { %1728 = vmatpush.msrb.mxu1 %v1463_v16 }
 0x350   : > { %v1148_v46 = vpop.xlane.xlu1 %1147 }
 0x351   : > { %2971 = vrcp.f32 %v1148_v46  ;;  %v1282_v61 = vand.u32 2147483648, %v1148_v46  ;;  %v1280_v63 = vand.u32 2147483647, %v1148_v46  ;;  %vm1276_vm12 = vweird.f32 %v1148_v46 }
 0x353   : > { %v1283_v1 = vor.u32 1.1754944e-38, %v1282_v61  ;;  %vm1281_vm14 = vcmp.eq.f32.partialorder %v1280_v63, 8.507059e+37 }
 0x357   : > { %v2972_v53 = vpop.eup %2971 }
 0x358   : > { %v1272_v54 = vmul.f32 %v2972_v53, %v1148_v46  ;;  %v1049_v42 = vpop.xlane.xlu1 %1048  ;;  %vm1277_vm11 = vweird.f32 %v2972_v53 }
 0x359   : > { %v1083_v55 = vsub.f32 %v3408_v47, %v1049_v42  ;;  %vm1278_vm13 = vmor %vm1276_vm12, %vm1277_vm11 }
 0x35a   : > { %v1273_v57 = vsub.f32 1.0, %v1272_v54 }
 0x35b   : > { %v1105_v62 = vmul.f32 1.442695, %v1083_v55 }
 0x35c   : > { %v1274_v18 = vmul.f32 %v2972_v53, %v1273_v57 }
 0x35d   : > { %2973 = vpow2.f32 %v1105_v62 }
 0x35e   : > { %v1275_v45 = vadd.f32 %v2972_v53, %v1274_v18 }
 0x360   : > { %v1279_v17 = vsel %vm1278_vm13, %v2972_v53, %v1275_v45  ;;  %v1055_v2 = vpop.xlane.xlu1 %1054 }
 0x361   : > { %v1284_v47 = vsel %vm1281_vm14, %v1283_v1, %v1279_v17  ;;  %v1085_v19 = vsub.f32 %v3411_v51, %v1055_v2 }
 0x362   : > { %v3575_v22 = vmul.f32 %v3470_v12, %v1284_v47 }
 0x363   : > { %v3577_v15 = vpop.eup %2973  ;;  %v1109_v23 = vmul.f32 1.442695, %v1085_v19 }
 0x364   : > { %2817 = vmatmul.msk.f32.vlgmr.msra.gmra.mxu1 %vm1028_vm2, %v3575_v22  ;;  %2568 = vst.msk [vmem:[%s3543_s16 + $0x38] sm:$0xff] %vm1028_vm2, %v3575_v22  ;;  %v1143_v24 = vsel %vm1028_vm2, %v3577_v15, 0.0 }
 0x365   : > { %2975 = vpow2.f32 %v1109_v23  ;;  %1144 = vadd.xlane.f32.xlu2 %v1143_v24  ;;  %1797 = vmatpush.msra.mxu1 %v1472_v13 }
 0x368   : > { %v1157_v51 = vpop.xlane.xlu0 %1156 }
 0x369   : > { %2977 = vrcp.f32 %v1157_v51  ;;  %v1324_v9 = vand.u32 2147483648, %v1157_v51  ;;  %v1322_v30 = vand.u32 2147483647, %v1157_v51  ;;  %vm1318_vm3 = vweird.f32 %v1157_v51 }
 0x36b   : > { %v3588_v12 = vpop.eup %2975  ;;  %v1325_v32 = vor.u32 1.1754944e-38, %v1324_v9  ;;  %vm1323_vm5 = vcmp.eq.f32.partialorder %v1322_v30, 8.507059e+37 }
 0x36c   : > { %v1149_v25 = vsel %vm1028_vm2, %v3588_v12, 0.0 }
 0x36d   : > { %1150 = vadd.xlane.f32.xlu1 %v1149_v25 }
 0x36f   : > { %v2978_v8 = vpop.eup %2977 }
 0x370   : > { %v1314_v26 = vmul.f32 %v2978_v8, %v1157_v51  ;;  %vm1319_vm15 = vweird.f32 %v2978_v8 }
 0x371   : > { %vm1320_vm4 = vmor %vm1318_vm3, %vm1319_vm15 }
 0x372   : > { %v1315_v4 = vsub.f32 1.0, %v1314_v26 }
 0x374   : > { %v1316_v28 = vmul.f32 %v2978_v8, %v1315_v4 }
 0x376   : > { %v1317_v10 = vadd.f32 %v2978_v8, %v1316_v28 }
 0x378   : > { %v1321_v14 = vsel %vm1320_vm4, %v2978_v8, %v1317_v10 }
 0x379   : > { %v1326_v33 = vsel %vm1323_vm5, %v1325_v32, %v1321_v14 }
 0x37a   : > { %v3594_v34 = vmul.f32 %v3485_v5, %v1326_v33 }
 0x37c   : > { %2820 = vmatmul.msk.f32.vlgmr.msrb.gmra.mxu1 %vm1028_vm2, %v3594_v34  ;;  %2571 = vst.msk [vmem:[%s3543_s16 + $0x50] sm:$0xff] %vm1028_vm2, %v3594_v34 }
 0x37d   : > { %1864 = vmatpush.msrb.mxu1 %v2701_v21 }
 0x37f   : > { %1865 = vmatpush.msrb.mxu1 %v2700_v35 }
 0x380   : > { %v1166_v36 = vpop.xlane.xlu2 %1165 }
 0x381   : > { %2979 = vrcp.f32 %v1166_v36  ;;  %v1366_v38 = vand.u32 2147483648, %v1166_v36  ;;  %v1364_v53 = vand.u32 2147483647, %v1166_v36  ;;  %vm1360_vm7 = vweird.f32 %v1166_v36 }
 0x383   : > { %v1367_v55 = vor.u32 1.1754944e-38, %v1366_v38  ;;  %vm1365_vm9 = vcmp.eq.f32.partialorder %v1364_v53, 8.507059e+37 }
 0x387   : > { %v2980_v5 = vpop.eup %2979 }
 0x388   : > { %v1356_v20 = vmul.f32 %v2980_v5, %v1166_v36  ;;  %v1127_v0 = vpop.xlane.xlu0 %1126  ;;  %v1133_v39 = vpop.xlane.xlu2 %1132  ;;  %vm1361_vm6 = vweird.f32 %v2980_v5 }
 0x389   : > { %2981 = vrcp.f32 %v1127_v0  ;;  %vm1362_vm8 = vmor %vm1360_vm7, %vm1361_vm6  ;;  %v1182_v2 = vand.u32 2147483647, %v1127_v0  ;;  %v1184_v47 = vand.u32 2147483648, %v1127_v0  ;;  %v1210_v23 = vand.u32 2147483647, %v1133_v39 }
 0x38a   : > { %v1357_v40 = vsub.f32 1.0, %v1356_v20  ;;  %2983 = vrcp.f32 %v1133_v39  ;;  %v1212_v8 = vand.u32 2147483648, %v1133_v39  ;;  %vm1178_vm12 = vweird.f32 %v1127_v0 }
 0x38b   : > { %vm1206_vm14 = vweird.f32 %v1133_v39  ;;  %vm1183_vm15 = vcmp.eq.f32.partialorder %v1182_v2, 8.507059e+37  ;;  %vm1211_vm4 = vcmp.eq.f32.partialorder %v1210_v23, 8.507059e+37  ;;  %v1457_v20 = vadd.f32 %v3503_v50, %v3557_v43 }
 0x38c   : > { %v1358_v46 = vmul.f32 %v2980_v5, %v1357_v40  ;;  %v1213_v28 = vor.u32 1.1754944e-38, %v1212_v8  ;;  %v1466_v8 = vadd.f32 %v3503_v50, %v3572_v11  ;;  %v3015_v11 = vld [vmem:[%s3189_s13 + $0x10] sm:$0xff] }
 0x38e   : > { %v1359_v54 = vadd.f32 %v2980_v5, %v1358_v46 }
 0x38f   : > { %v2982_v42 = vpop.eup %2981 }
 0x390   : > { %v2984_v56 = vpop.eup %2983  ;;  %v1363_v57 = vsel %vm1362_vm8, %v2980_v5, %v1359_v54  ;;  %v1174_v16 = vmul.f32 %v2982_v42, %v1127_v0  ;;  %v1058_v61 = vpop.xlane.xlu0 %1057  ;;  %vm1179_vm10 = vweird.f32 %v2982_v42  ;;  %v1451_v5 = vadd.f32 %v3503_v50, %v3554_v31 }
 0x391   : > { %v1064_v62 = vpop.xlane.xlu2 %1063  ;;  %v1368_v18 = vsel %vm1365_vm9, %v1367_v55, %v1363_v57  ;;  %v1202_v63 = vmul.f32 %v2984_v56, %v1133_v39  ;;  %v1086_v45 = vsub.f32 %v3413_v52, %v1058_v61  ;;  %v3608_v1 = vpop.xlane.xlu1 %1135  ;;  %vm1207_vm11 = vweird.f32 %v2984_v56  ;;  %vm1180_vm13 = vmor %vm1178_vm12, %vm1179_vm10 }
 0x392   : > { %v1175_v17 = vsub.f32 1.0, %v1174_v16  ;;  %2985 = vrcp.f32 %v3608_v1  ;;  %v1088_v51 = vsub.f32 %v3422_v58, %v1064_v62  ;;  %v3613_v26 = vmul.f32 %v3496_v37, %v1368_v18  ;;  %vm1208_vm3 = vmor %vm1206_vm14, %vm1207_vm11  ;;  %v3662_v62 = vpop.f32.mrf.mxu3 }
 0x393   : > { %v1203_v19 = vsub.f32 1.0, %v1202_v63  ;;  %v1111_v24 = vmul.f32 1.442695, %v1086_v45  ;;  %v1185_v58 = vor.u32 1.1754944e-38, %v1184_v47  ;;  %v1226_v40 = vand.u32 2147483648, %v3608_v1 }
 0x394   : > { %v1176_v25 = vmul.f32 %v2982_v42, %v1175_v17  ;;  %v1115_v4 = vmul.f32 1.442695, %v1088_v51  ;;  %2823 = vmatmul.msk.f32.vlgmr.msra.gmra.mxu1 %vm1028_vm2, %v3613_v26  ;;  %2574 = vst.msk [vmem:[%s3543_s16 + $0x68] sm:$0xff] %vm1028_vm2, %v3613_v26  ;;  %v1224_v43 = vand.u32 2147483647, %v3608_v1  ;;  %vm1220_vm6 = vweird.f32 %v3608_v1 }
 0x395   : > { %v1204_v52 = vmul.f32 %v2984_v56, %v1203_v19  ;;  %2987 = vpow2.f32 %v1111_v24  ;;  %v1227_v55 = vor.u32 1.1754944e-38, %v1226_v40  ;;  %v1460_v63 = vadd.f32 %v3503_v50, %v3567_v49  ;;  %v3014_v49 = vld [vmem:[%s3189_s13 + $0x8] sm:$0xff] }
 0x396   : > { %v1177_v27 = vadd.f32 %v2982_v42, %v1176_v25  ;;  %2989 = vpow2.f32 %v1115_v4  ;;  %vm1225_vm8 = vcmp.eq.f32.partialorder %v1224_v43, 8.507059e+37  ;;  %v3022_v40 = vld [vmem:[%s3189_s13 + $0x48] sm:$0xff] }
 0x397   : > { %v1205_v9 = vadd.f32 %v2984_v56, %v1204_v52 }
 0x398   : > { %v2986_v13 = vpop.eup %2985  ;;  %v1181_v37 = vsel %vm1180_vm13, %v2982_v42, %v1177_v27  ;;  %v3621_v30 = vpop.xlane.xlu0 %1141 }
 0x399   : > { %v1186_v10 = vsel %vm1183_vm15, %v1185_v58, %v1181_v37  ;;  %v1209_v32 = vsel %vm1208_vm3, %v2984_v56, %v1205_v9  ;;  %v1216_v14 = vmul.f32 %v2986_v13, %v3608_v1  ;;  %v1067_v33 = vpop.xlane.xlu1 %1066  ;;  %2991 = vrcp.f32 %v3621_v30  ;;  %v3016_v9 = vld [vmem:[%s3189_s13 + $0x18] sm:$0xff]  ;;  %v3019_v37 = vld [vmem:[%s3189_s13 + $0x30] sm:$0xff] }
 0x39a   : > { %v1214_v21 = vsel %vm1211_vm4, %v1213_v28, %v1209_v32  ;;  %v1089_v35 = vsub.f32 %v3424_v59, %v1067_v33  ;;  %v3633_v39 = vmul.f32 %v3510_v48, %v1186_v10  ;;  %vm1221_vm5 = vweird.f32 %v2986_v13  ;;  %v3020_v28 = vld [vmem:[%s3189_s13 + $0x38] sm:$0xff]  ;;  %v3021_v10 = vld [vmem:[%s3189_s13 + $0x40] sm:$0xff] }
 0x39b   : > { %v3626_v36 = vpop.eup %2987  ;;  %v1217_v0 = vsub.f32 1.0, %v1216_v14  ;;  %v3637_v38 = vmul.f32 %v3505_v41, %v1214_v21  ;;  %v3013_v41 = vld [vmem:[%s3189_s13] sm:$0xff]  ;;  %vm1222_vm7 = vmor %vm1220_vm6, %vm1221_vm5  ;;  %v1252_v47 = vand.u32 2147483647, %v3621_v30  ;;  %v1254_v19 = vand.u32 2147483648, %v3621_v30 }
 0x39c   : > { %v1117_v59 = vmul.f32 1.442695, %v1089_v35  ;;  %v1152_v46 = vsel %vm1028_vm2, %v3626_v36, 0.0  ;;  %v3641_v53 = vpop.eup %2989  ;;  %2810 = vmatmul.msk.f32.vlgmr.msrb.gmra.mxu3 %vm1028_vm2, %v3633_v39  ;;  %2561 = vst.msk [vmem:[%s3543_s16] sm:$0xff] %vm1028_vm2, %v3633_v39  ;;  %2826 = vmatmul.msk.f32.vlgmr.msrb.gmra.mxu1 %vm285_vm0, %v3013_v41  ;;  %vm1248_vm10 = vweird.f32 %v3621_v30 }
 0x39d   : > { %v1218_v31 = vmul.f32 %v2986_v13, %v1217_v0  ;;  %1153 = vadd.xlane.f32.xlu2 %v1152_v46  ;;  %2812 = vmatmul.msk.f32.vlgmr.msra.gmra.mxu2 %vm1028_vm2, %v3637_v38  ;;  %2563 = vst.msk [vmem:[%s3543_s16 + $0x10] sm:$0xff] %vm1028_vm2, %v3637_v38  ;;  %v1158_v48 = vsel %vm1028_vm2, %v3641_v53, 0.0  ;;  %v1255_v51 = vor.u32 1.1754944e-38, %v1254_v19  ;;  %vm1253_vm12 = vcmp.eq.f32.partialorder %v1252_v47, 8.507059e+37  ;;  %v3025_v47 = vld [vmem:[%s3189_s13 + $0x60] sm:$0xff] }
 0x39e   : > { %2993 = vpow2.f32 %v1117_v59  ;;  %1159 = vadd.xlane.f32.xlu0 %v1158_v48  ;;  %1636 = vmatpush.msrb.mxu3 %v1451_v5 }
 0x39f   : > { %v1219_v54 = vadd.f32 %v2986_v13, %v1218_v31  ;;  %v2992_v42 = vpop.eup %2991  ;;  %1682 = vmatpush.msra.mxu2 %v1457_v20 }
 0x3a0   : > { %v1073_v56 = vpop.xlane.xlu0 %1072  ;;  %v1244_v16 = vmul.f32 %v2992_v42, %v3621_v30  ;;  %vm1249_vm9 = vweird.f32 %v2992_v42 }
 0x3a1   : > { %v1223_v57 = vsel %vm1222_vm7, %v2986_v13, %v1219_v54  ;;  %v1091_v61 = vsub.f32 %v3532_v7, %v1073_v56  ;;  %v1074_v7 = vsel %vm1028_vm2, %v3662_v62, -inf  ;;  %vm1250_vm11 = vmor %vm1248_vm10, %vm1249_vm9  ;;  %v3018_v13 = vld [vmem:[%s3189_s13 + $0x28] sm:$0xff] }
 0x3a2   : > { %v1228_v18 = vsel %vm1225_vm8, %v1227_v55, %v1223_v57  ;;  %v1245_v45 = vsub.f32 1.0, %v1244_v16 }
 0x3a3   : > { %v1121_v1 = vmul.f32 1.442695, %v1091_v61  ;;  %v3667_v17 = vmul.f32 %v3518_v60, %v1228_v18 }
 0x3a4   : > { %v3669_v2 = vpop.eup %2993  ;;  %v1246_v23 = vmul.f32 %v2992_v42, %v1245_v45  ;;  %2827 = vmatmul.msk.f32.gmra.mxu1 %vm285_vm0, %v3014_v49  ;;  %v3024_v45 = vld [vmem:[%s3189_s13 + $0x58] sm:$0xff] }
 0x3a5   : > { %2995 = vpow2.f32 %v1121_v1  ;;  %2813 = vmatmul.msk.f32.vlgmr.msra.gmra.mxu3 %vm1028_vm2, %v3667_v17  ;;  %2564 = vst.msk [vmem:[%s3543_s16 + $0x18] sm:$0xff] %vm1028_vm2, %v3667_v17  ;;  %v1161_v60 = vsel %vm1028_vm2, %v3669_v2, 0.0 }
 0x3a6   : > { %1162 = vadd.xlane.f32.xlu1 %v1161_v60  ;;  %v1247_v24 = vadd.f32 %v2992_v42, %v1246_v23  ;;  %1075 = vmax.xlane.f32.xlu0 %v1074_v7  ;;  %v3026_v7 = vld [vmem:[%s3189_s13 + $0x68] sm:$0xff]  ;;  %v3027_v23 = vld [vmem:[%s3189_s13 + $0x70] sm:$0xff] }
 0x3a7   : > { %1705 = vmatpush.msra.mxu3 %v1460_v63 }
 0x3a8   : > { %v1251_v25 = vsel %vm1250_vm11, %v2992_v42, %v1247_v24  ;;  %v1469_v42 = vadd.f32 %v3503_v50, %v3586_v3 }
 0x3a9   : > { %v1256_v52 = vsel %vm1253_vm12, %v1255_v51, %v1251_v25  ;;  %v1474_v51 = vpop.f32.mrf.mxu0 }
 0x3aa   : > { %v3690_v27 = vmul.f32 %v3526_v6, %v1256_v52  ;;  %v3017_v6 = vld [vmem:[%s3189_s13 + $0x20] sm:$0xff]  ;;  %v1475_v25 = vadd.f32 %v3503_v50, %v1474_v51 }
 0x3ab   : > { %v3687_v4 = vpop.eup %2995 }
 0x3ac   : > { %v1167_v58 = vsel %vm1028_vm2, %v3687_v4, 0.0  ;;  %2815 = vmatmul.msk.f32.vlgmr.msrb.gmra.mxu2 %vm1028_vm2, %v3690_v27  ;;  %2566 = vst.msk [vmem:[%s3543_s16 + $0x28] sm:$0xff] %vm1028_vm2, %v3690_v27  ;;  %2828 = vmatmul.msk.f32.gmra.mxu1 %vm285_vm0, %v3015_v11 }
 0x3ad   : > { %1168 = vadd.xlane.f32.xlu2 %v1167_v58  ;;  %1751 = vmatpush.msrb.mxu2 %v1466_v8  ;;  %v3028_v8 = vld [vmem:[%s3189_s13 + $0x78] sm:$0xff] }
 0x3b1   : > { %v3737_v1 = vpop.f32.mrf.mxu1 }
 0x3b4   : > { %2829 = vmatmul.msk.f32.gmra.mxu1 %vm285_vm0, %v3016_v9 }
 0x3bc   : > { %2830 = vmatmul.msk.f32.gmra.mxu1 %vm285_vm0, %v3017_v6 }
 0x3c4   : > { %2831 = vmatmul.msk.f32.gmra.mxu1 %vm285_vm0, %v3018_v13 }
 0x3c9   : > { %v3741_v19 = vpop.f32.mrf.mxu1 }
 0x3cc   : > { %2832 = vmatmul.msk.f32.gmra.mxu1 %vm285_vm0, %v3019_v37 }
 0x3d4   : > { %2833 = vmatmul.msk.f32.gmra.mxu1 %vm285_vm0, %v3020_v28 }
 0x3d8   : > { %v1145_v30 = vpop.xlane.xlu2 %1144 }
 0x3d9   : > { %2997 = vrcp.f32 %v1145_v30  ;;  %v1268_v35 = vand.u32 2147483648, %v1145_v30  ;;  %v1266_v20 = vand.u32 2147483647, %v1145_v30  ;;  %vm1262_vm14 = vweird.f32 %v1145_v30 }
 0x3db   : > { %v1269_v46 = vor.u32 1.1754944e-38, %v1268_v35  ;;  %vm1267_vm3 = vcmp.eq.f32.partialorder %v1266_v20, 8.507059e+37 }
 0x3dc   : > { %2834 = vmatmul.msk.f32.gmra.mxu1 %vm285_vm0, %v3021_v10 }
 0x3df   : > { %v2998_v32 = vpop.eup %2997 }
 0x3e0   : > { %v1258_v14 = vmul.f32 %v2998_v32, %v1145_v30  ;;  %v1151_v33 = vpop.xlane.xlu1 %1150  ;;  %vm1263_vm13 = vweird.f32 %v2998_v32 }
 0x3e1   : > { %2999 = vrcp.f32 %v1151_v33  ;;  %vm1264_vm15 = vmor %vm1262_vm14, %vm1263_vm13  ;;  %v1296_v55 = vand.u32 2147483648, %v1151_v33  ;;  %v1294_v57 = vand.u32 2147483647, %v1151_v33  ;;  %vm1290_vm5 = vweird.f32 %v1151_v33 }
 0x3e2   : > { %v1259_v21 = vsub.f32 1.0, %v1258_v14 }
 0x3e3   : > { %v1297_v3 = vor.u32 1.1754944e-38, %v1296_v55  ;;  %vm1295_vm7 = vcmp.eq.f32.partialorder %v1294_v57, 8.507059e+37 }
 0x3e4   : > { %v1260_v5 = vmul.f32 %v2998_v32, %v1259_v21  ;;  %2835 = vmatmul.msk.f32.gmra.mxu1 %vm285_vm0, %v3022_v40 }
 0x3e6   : > { %v1261_v0 = vadd.f32 %v2998_v32, %v1260_v5 }
 0x3e7   : > { %v3000_v59 = vpop.eup %2999 }
 0x3e8   : > { %v1265_v31 = vsel %vm1264_vm15, %v2998_v32, %v1261_v0  ;;  %v1286_v43 = vmul.f32 %v3000_v59, %v1151_v33  ;;  %vm1291_vm4 = vweird.f32 %v3000_v59 }
 0x3e9   : > { %v1270_v41 = vsel %vm1267_vm3, %v1269_v46, %v1265_v31  ;;  %vm1292_vm6 = vmor %vm1290_vm5, %vm1291_vm4 }
 0x3ea   : > { %v1287_v48 = vsub.f32 1.0, %v1286_v43  ;;  %v3716_v54 = vmul.f32 %v3577_v15, %v1270_v41  ;;  %v3023_v15 = vld [vmem:[%s3189_s13 + $0x50] sm:$0xff]  ;;  %s2597_s13 = sshll.u32 %s2594_s17, 4  ;;  %s2598_s13 = int_to_ptr.hbm [resolvable:$true] %s2597_s13 }
 0x3eb   : > { %s3044_s25 = sshra.s32 %s2598_s13, 4  ;;  %s3045_s25 = int_to_ptr.hbm [resolvable:$true] %s3044_s25 }
 0x3ec   : > { %v1288_v56 = vmul.f32 %v3000_v59, %v1287_v48  ;;  %2816 = vmatmul.msk.f32.vlgmr.msrb.gmra.mxu3 %vm1028_vm2, %v3716_v54  ;;  %2567 = vst.msk [vmem:[%s3543_s16 + $0x30] sm:$0xff] %vm1028_vm2, %v3716_v54  ;;  %2836 = vmatmul.msk.f32.gmra.mxu1 %vm285_vm0, %v3023_v15  ;;  %s3046_s26 = scalar_lea.hbm %s3045_s25, 128  ;;  %p3051_p0 = scmp.lt.s32.totalorder %s3045_s25, %s4104_s4 }
 0x3ed   : > { %1774 = vmatpush.msrb.mxu3 %v1469_v42  ;;  %p3047_p11 = scmp.ne.s32.totalorder %s3045_s25, %s3046_s26  ;;  %p3052_p1 = scmp.lt.s32.totalorder %s3050_s7, %s3046_s26 }
 0x3ee   : > { %v1289_v16 = vadd.f32 %v3000_v59, %v1288_v56 }
 0x3ef   : > { %p3048_p12 = pnand %p3047_p11, %p3164_p5  ;;  %p3053_p2 = por %p3052_p1, %p3051_p0 }
 0x3f0   : > { %v1293_v61 = vsel %vm1292_vm6, %v3000_v59, %v1289_v16 }
 0x3f1   : > { %v1298_v18 = vsel %vm1295_vm7, %v1297_v3, %v1293_v61  ;;  %p3049_p13 = pneg %p3048_p12 }
 0x3f2   : > { %v3728_v63 = vmul.f32 %v3588_v12, %v1298_v18  ;;  %v3745_v12 = vpop.f32.mrf.mxu1 }
 0x3f3   : > { %p3054_p3 = pnand %p3053_p2, %p3049_p13 }
 0x3f4   : > { %2818 = vmatmul.msk.f32.vlgmr.msra.gmra.mxu2 %vm1028_vm2, %v3728_v63  ;;  %2569 = vst.msk [vmem:[%s3543_s16 + $0x40] sm:$0xff] %vm1028_vm2, %v3728_v63  ;;  %2837 = vmatmul.msk.f32.gmra.mxu1 %vm285_vm0, %v3024_v45 }
 0x3f5   : > { %1820 = vmatpush.msra.mxu2 %v1475_v25 }
 0x3fa   : > { %v3749_v60 = vpop.f32.mrf.mxu1 }
 0x3fc   : > { %2838 = vmatmul.msk.f32.gmra.mxu1 %vm285_vm0, %v3025_v47 }
 0x404   : > { %2839 = vmatmul.msk.f32.gmra.mxu1 %vm285_vm0, %v3026_v7 }
 0x40c   : > { %2840 = vmatmul.msk.f32.gmra.mxu1 %vm285_vm0, %v3027_v23 }
 0x410   : > { %v1154_v49 = vpop.xlane.xlu2 %1153 }
 0x411   : > { %3001 = vrcp.f32 %v1154_v49  ;;  %v1160_v24 = vpop.xlane.xlu0 %1159  ;;  %v3754_v11 = vpop.f32.mrf.mxu1  ;;  %v1310_v30 = vand.u32 2147483648, %v1154_v49  ;;  %v1308_v50 = vand.u32 2147483647, %v1154_v49  ;;  %vm1304_vm9 = vweird.f32 %v1154_v49 }
 0x412   : > { %3003 = vrcp.f32 %v1160_v24  ;;  %v1338_v33 = vand.u32 2147483648, %v1160_v24  ;;  %v1336_v20 = vand.u32 2147483647, %v1160_v24  ;;  %vm1332_vm12 = vweird.f32 %v1160_v24 }
 0x413   : > { %v1311_v0 = vor.u32 1.1754944e-38, %v1310_v30  ;;  %vm1309_vm11 = vcmp.eq.f32.partialorder %v1308_v50, 8.507059e+37 }
 0x414   : > { %2841 = vmatmul.msk.f32.gmra.mxu1 %vm285_vm0, %v3028_v8  ;;  %v1339_v43 = vor.u32 1.1754944e-38, %v1338_v33  ;;  %vm1337_vm14 = vcmp.eq.f32.partialorder %v1336_v20, 8.507059e+37  ;;  %v2706_v8 = vld [vmem:[%s4102_s2 + $0x40] sm:$0xff] }
 0x417   : > { %v3002_v52 = vpop.eup %3001 }
 0x418   : > { %v1300_v58 = vmul.f32 %v3002_v52, %v1154_v49  ;;  %v3004_v9 = vpop.eup %3003  ;;  %vm1305_vm8 = vweird.f32 %v3002_v52  ;;  %v2707_v49 = vld [vmem:[%s4102_s2 + $0x48] sm:$0xff] }
 0x419   : > { %v1163_v6 = vpop.xlane.xlu1 %1162  ;;  %v1328_v37 = vmul.f32 %v3004_v9, %v1160_v24  ;;  %v1076_v28 = vpop.xlane.xlu0 %1075  ;;  %vm1333_vm0 = vweird.f32 %v3004_v9  ;;  %vm1306_vm10 = vmor %vm1304_vm9, %vm1305_vm8 }
 0x41a   : > { %v1301_v13 = vsub.f32 1.0, %v1300_v58  ;;  %3005 = vrcp.f32 %v1163_v6  ;;  %v1092_v10 = vsub.f32 %v3662_v62, %v1076_v28  ;;  %vm1334_vm13 = vmor %vm1332_vm12, %vm1333_vm0  ;;  %v1867_v55 = vpop.f32.mrf.mxu1  ;;  %v1352_v16 = vand.u32 2147483648, %v1163_v6  ;;  %v3795_v58 = vld [vmem:[%s4103_s3 + $0x3] ss:$0 sm:$0xff] }
 0x41b   : > { %v1329_v14 = vsub.f32 1.0, %v1328_v37  ;;  %v1350_v18 = vand.u32 2147483647, %v1163_v6  ;;  %vm1346_vm3 = vweird.f32 %v1163_v6 }
 0x41c   : > { %v1302_v32 = vmul.f32 %v3002_v52, %v1301_v13  ;;  %v1123_v21 = vmul.f32 1.442695, %v1092_v10  ;;  %v1353_v23 = vor.u32 1.1754944e-38, %v1352_v16 }
 0x41d   : > { %v1330_v5 = vmul.f32 %v3004_v9, %v1329_v14  ;;  %vm1351_vm5 = vcmp.eq.f32.partialorder %v1350_v18, 8.507059e+37 }
 0x41e   : > { %v1303_v35 = vadd.f32 %v3002_v52, %v1302_v32  ;;  %3007 = vpow2.f32 %v1123_v21 }
 0x41f   : > { %v1331_v46 = vadd.f32 %v3004_v9, %v1330_v5  ;;  %v1500_v10 = vpop.f32.mrf.mxu3 }
 0x420   : > { %v3006_v40 = vpop.eup %3005  ;;  %v1307_v59 = vsel %vm1306_vm10, %v3002_v52, %v1303_v35  ;;  %v1169_v62 = vpop.xlane.xlu2 %1168  ;;  %v1931_v21 = vmax.f32 %v1500_v10, 0.0 }
 0x421   : > { %v1312_v31 = vsel %vm1309_vm11, %v1311_v0, %v1307_v59  ;;  %v1342_v41 = vmul.f32 %v3006_v40, %v1163_v6  ;;  %v1335_v42 = vsel %vm1334_vm13, %v3004_v9, %v1331_v46  ;;  %3009 = vrcp.f32 %v1169_v62 }
 0x422   : > { %v3758_v48 = vmul.f32 %v3626_v36, %v1312_v31  ;;  %v1340_v56 = vsel %vm1337_vm14, %v1339_v43, %v1335_v42  ;;  %v2709_v36 = vld [vmem:[%s4102_s2 + $0x58] sm:$0xff]  ;;  %vm1347_vm15 = vweird.f32 %v3006_v40  ;;  %v1380_v6 = vand.u32 2147483648, %v1169_v62  ;;  %v1870_v13 = vpop.f32.mrf.mxu1  ;;  %v1546_v43 = vpop.f32.mrf.mxu2 }
 0x423   : > { %v1343_v57 = vsub.f32 1.0, %v1342_v41  ;;  %v3766_v15 = vmul.f32 %v3641_v53, %v1340_v56  ;;  %v2708_v53 = vld [vmem:[%s4102_s2 + $0x50] sm:$0xff]  ;;  %vm1348_vm4 = vmor %vm1346_vm3, %vm1347_vm15  ;;  %v1378_v28 = vand.u32 2147483647, %v1169_v62  ;;  %vm1374_vm7 = vweird.f32 %v1169_v62 }
 0x424   : > { %2570 = vst.msk [vmem:[%s3543_s16 + $0x48] sm:$0xff] %vm1028_vm2, %v3758_v48  ;;  %2819 = vmatmul.msk.f32.vlgmr.msra.gmra.mxu3 %vm1028_vm2, %v3758_v48  ;;  %v3771_v3 = vpop.eup %3007  ;;  %v1381_v32 = vor.u32 1.1754944e-38, %v1380_v6  ;;  %v1871_v0 = vadd.f32 %v3795_v58, %v1870_v13  ;;  %v1932_v46 = vmax.f32 %v3737_v1, 0.0 }
 0x425   : > { %v1344_v61 = vmul.f32 %v3006_v40, %v1343_v57  ;;  %2821 = vmatmul.msk.f32.vlgmr.msrb.gmra.mxu2 %vm1028_vm2, %v3766_v15  ;;  %2572 = vst.msk [vmem:[%s3543_s16 + $0x58] sm:$0xff] %vm1028_vm2, %v3766_v15  ;;  %v1170_v45 = vsel %vm1028_vm2, %v3771_v3, 0.0  ;;  %vm1379_vm9 = vcmp.eq.f32.partialorder %v1378_v28, 8.507059e+37 }
 0x426   : > { %1171 = vadd.xlane.f32.xlu1 %v1170_v45  ;;  %2041 = vmatpush.msrb.mxu2 %v2709_v36  ;;  %v1916_v59 = vmax.f32 %v1871_v0, 0.0 }
 0x427   : > { %v1345_v47 = vadd.f32 %v3006_v40, %v1344_v61  ;;  %v3010_v7 = vpop.eup %3009 }
 0x428   : > { %v1370_v51 = vmul.f32 %v3010_v7, %v1169_v62  ;;  %2042 = vmatpush.msrb.mxu2 %v2708_v53  ;;  %vm1375_vm6 = vweird.f32 %v3010_v7  ;;  %v1569_v16 = vpop.f32.mrf.mxu3 }
 0x429   : > { %v1349_v24 = vsel %vm1348_vm4, %v3006_v40, %v1345_v47  ;;  %vm1376_vm8 = vmor %vm1374_vm7, %vm1375_vm6  ;;  %v1934_v18 = vmax.f32 %v1569_v16, 0.0 }
 0x42a   : > { %v1354_v25 = vsel %vm1351_vm5, %v1353_v23, %v1349_v24  ;;  %v1371_v9 = vsub.f32 1.0, %v1370_v51  ;;  %2043 = vmatpush.msrb.mxu2 %v2707_v49  ;;  %v1873_v5 = vpop.f32.mrf.mxu1  ;;  %v1935_v49 = vmax.f32 %v3741_v19, 0.0 }
 0x42b   : > { %v3790_v52 = vmul.f32 %v3669_v2, %v1354_v25  ;;  %v1868_v2 = vadd.f32 %v3795_v58, %v1867_v55  ;;  %v1874_v62 = vadd.f32 %v3795_v58, %v1873_v5  ;;  %v1933_v55 = vmax.f32 %v1546_v43, 0.0 }
 0x42c   : > { %v1372_v37 = vmul.f32 %v3010_v7, %v1371_v9  ;;  %2044 = vmatpush.msrb.mxu2 %v2706_v8  ;;  %v1938_v5 = vmax.f32 %v3745_v12, 0.0  ;;  %v1477_v12 = vpop.f32.mrf.mxu0 }
 0x42d   : > { %2573 = vst.msk [vmem:[%s3543_s16 + $0x60] sm:$0xff] %vm1028_vm2, %v3790_v52  ;;  %2822 = vmatmul.msk.f32.vlgmr.msrb.gmra.mxu3 %vm1028_vm2, %v3790_v52  ;;  %v1915_v33 = vmax.f32 %v1868_v2, 0.0  ;;  %v1917_v42 = vmax.f32 %v1874_v62, 0.0 }
 0x42e   : > { %v1373_v30 = vadd.f32 %v3010_v7, %v1372_v37 }
 0x42f   : > { %v1947_v20 = vadd.f32 %v1931_v21, %v1915_v33  ;;  %v1949_v56 = vadd.f32 %v1933_v55, %v1917_v42  ;;  %v1615_v25 = vpop.f32.mrf.mxu2  ;;  %v3029_v55 = vld [vmem:[%s4103_s3 + $0x2] ss:$0 sm:$0xff] }
 0x430   : > { %v1377_v50 = vsel %vm1376_vm8, %v3010_v7, %v1373_v30  ;;  %v1936_v6 = vmax.f32 %v1615_v25, 0.0 }
 0x431   : > { %v1382_v14 = vsel %vm1379_vm9, %v1381_v32, %v1377_v50  ;;  %v3812_v40 = vmul.f32 0.125, %v1947_v20  ;;  %v3823_v36 = vmul.f32 0.125, %v1949_v56  ;;  %v1478_v56 = vadd.f32 %v3029_v55, %v1477_v12 }
 0x432   : > { %v3804_v35 = vmul.f32 %v3687_v4, %v1382_v14  ;;  %v1948_v4 = vadd.f32 %v1932_v46, %v1916_v59  ;;  %v1876_v31 = vpop.f32.mrf.mxu1 }
 0x433   : > { %v1877_v57 = vadd.f32 %v3795_v58, %v1876_v31  ;;  %1843 = vmatpush.msra.mxu3 %v1478_v56 }
 0x434   : > { %2575 = vst.msk [vmem:[%s3543_s16 + $0x70] sm:$0xff] %vm1028_vm2, %v3804_v35  ;;  %2824 = vmatmul.msk.f32.vlgmr.msra.gmra.mxu2 %vm1028_vm2, %v3804_v35  ;;  %v3818_v41 = vmul.f32 0.125, %v1948_v4 }
 0x435   : > { %v1918_v61 = vmax.f32 %v1877_v57, 0.0 }
 0x437   : > { %v1950_v45 = vadd.f32 %v1934_v18, %v1918_v61 }
 0x439   : > { %v3828_v47 = vmul.f32 0.125, %v1950_v45 }
 0x43a   : > { %v1879_v1 = vpop.f32.mrf.mxu1 }
 0x43b   : > { %v1880_v53 = vadd.f32 %v3795_v58, %v1879_v1 }
 0x43c   : > { %2842 = vmatmul.msk.f32.vlgmr.msrb.gmra.mxu2 %vm417_vm1, %v3812_v40 }
 0x43d   : > { %v1919_v7 = vmax.f32 %v1880_v53, 0.0 }
 0x43f   : > { %v1951_v24 = vadd.f32 %v1935_v49, %v1919_v7 }
 0x441   : > { %v3834_v8 = vmul.f32 0.125, %v1951_v24 }
 0x442   : > { %v1882_v23 = vpop.f32.mrf.mxu1 }
 0x443   : > { %v1883_v51 = vadd.f32 %v3795_v58, %v1882_v23 }
 0x444   : > { %2843 = vmatmul.msk.f32.gmra.mxu2 %vm417_vm1, %v3818_v41 }
 0x445   : > { %v1920_v9 = vmax.f32 %v1883_v51, 0.0 }
 0x447   : > { %v1952_v13 = vadd.f32 %v1936_v6, %v1920_v9 }
 0x449   : > { %v3838_v37 = vmul.f32 0.125, %v1952_v13 }
 0x44a   : > { %v1885_v28 = vpop.f32.mrf.mxu1 }
 0x44b   : > { %v1886_v19 = vadd.f32 %v3795_v58, %v1885_v28 }
 0x44c   : > { %2844 = vmatmul.msk.f32.gmra.mxu2 %vm417_vm1, %v3823_v36 }
 0x44d   : > { %v1921_v30 = vmax.f32 %v1886_v19, 0.0 }
 0x452   : > { %v1888_v2 = vpop.f32.mrf.mxu1 }
 0x453   : > { %v1889_v32 = vadd.f32 %v3795_v58, %v1888_v2 }
 0x454   : > { %2845 = vmatmul.msk.f32.gmra.mxu2 %vm417_vm1, %v3828_v47 }
 0x455   : > { %v1922_v33 = vmax.f32 %v1889_v32, 0.0 }
 0x457   : > { %v1954_v0 = vadd.f32 %v1938_v5, %v1922_v33 }
 0x459   : > { %v3850_v4 = vmul.f32 0.125, %v1954_v0 }
 0x45a   : > { %v1891_v20 = vpop.f32.mrf.mxu1 }
 0x45b   : > { %v1892_v59 = vadd.f32 %v3795_v58, %v1891_v20 }
 0x45c   : > { %2846 = vmatmul.msk.f32.gmra.mxu2 %vm417_vm1, %v3834_v8 }
 0x45d   : > { %v1923_v62 = vmax.f32 %v1892_v59, 0.0 }
 0x462   : > { %v1894_v57 = vpop.f32.mrf.mxu1 }
 0x463   : > { %v1895_v18 = vadd.f32 %v3795_v58, %v1894_v57 }
 0x464   : > { %2847 = vmatmul.msk.f32.gmra.mxu2 %vm417_vm1, %v3838_v37 }
 0x465   : > { %v1924_v23 = vmax.f32 %v1895_v18, 0.0 }
 0x46a   : > { %v1897_v1 = vpop.f32.mrf.mxu1 }
 0x46b   : > { %v1898_v25 = vadd.f32 %v3795_v58, %v1897_v1 }
 0x46f   : > { %v1638_v10 = vpop.f32.mrf.mxu3 }
 0x470   : > { %v1937_v50 = vmax.f32 %v1638_v10, 0.0  ;;  %v1925_v10 = vmax.f32 %v1898_v25, 0.0 }
 0x472   : > { %v1953_v14 = vadd.f32 %v1937_v50, %v1921_v30  ;;  %v1900_v13 = vpop.f32.mrf.mxu1 }
 0x473   : > { %v1901_v5 = vadd.f32 %v3795_v58, %v1900_v13 }
 0x474   : > { %v3844_v21 = vmul.f32 0.125, %v1953_v14  ;;  %v1941_v14 = vmax.f32 %v3749_v60, 0.0 }
 0x475   : > { %v1926_v59 = vmax.f32 %v1901_v5, 0.0 }
 0x476   : > { %2848 = vmatmul.msk.f32.gmra.mxu2 %vm417_vm1, %v3844_v21  ;;  %v1957_v33 = vadd.f32 %v1941_v14, %v1925_v10 }
 0x477   : > { %v1684_v46 = vpop.f32.mrf.mxu2 }
 0x478   : > { %v1939_v31 = vmax.f32 %v1684_v46, 0.0 }
 0x47a   : > { %v1955_v43 = vadd.f32 %v1939_v31, %v1923_v62  ;;  %v1903_v0 = vpop.f32.mrf.mxu1 }
 0x47b   : > { %v1904_v60 = vadd.f32 %v3795_v58, %v1903_v0 }
 0x47c   : > { %v3854_v42 = vmul.f32 0.125, %v1955_v43 }
 0x47d   : > { %v1927_v12 = vmax.f32 %v1904_v60, 0.0 }
 0x47e   : > { %2849 = vmatmul.msk.f32.gmra.mxu2 %vm417_vm1, %v3850_v4 }
 0x482   : > { %v1906_v57 = vpop.f32.mrf.mxu1 }
 0x483   : > { %v1907_v1 = vadd.f32 %v3795_v58, %v1906_v57 }
 0x486   : > { %2850 = vmatmul.msk.f32.gmra.mxu2 %vm417_vm1, %v3854_v42 }
 0x499   : > { %v1172_v16 = vpop.xlane.xlu1 %1171 }
 0x49a   : > { %3011 = vrcp.f32 %v1172_v16  ;;  %v1394_v7 = vand.u32 2147483648, %v1172_v16  ;;  %v1392_v24 = vand.u32 2147483647, %v1172_v16  ;;  %vm1388_vm10 = vweird.f32 %v1172_v16 }
 0x49c   : > { %v1395_v28 = vor.u32 1.1754944e-38, %v1394_v7  ;;  %vm1393_vm12 = vcmp.eq.f32.partialorder %v1392_v24, 8.507059e+37 }
 0x4a0   : > { %v3012_v61 = vpop.eup %3011 }
 0x4a1   : > { %v1384_v45 = vmul.f32 %v3012_v61, %v1172_v16  ;;  %vm1389_vm0 = vweird.f32 %v3012_v61  ;;  %v3887_v16 = vld [vmem:[%s4103_s3 + $0x4] ss:$0 sm:$0xff] }
 0x4a2   : > { %vm1390_vm11 = vmor %vm1388_vm10, %vm1389_vm0 }
 0x4a3   : > { %v1385_v53 = vsub.f32 1.0, %v1384_v45 }
 0x4a5   : > { %v1386_v49 = vmul.f32 %v3012_v61, %v1385_v53  ;;  %v1928_v53 = vmax.f32 %v1907_v1, 0.0 }
 0x4a7   : > { %v1707_v51 = vpop.f32.mrf.mxu3  ;;  %v1387_v9 = vadd.f32 %v3012_v61, %v1386_v49  ;;  %v1944_v49 = vmax.f32 %v3754_v11, 0.0 }
 0x4a8   : > { %v1940_v6 = vmax.f32 %v1707_v51, 0.0  ;;  %v1753_v20 = vpop.f32.mrf.mxu2 }
 0x4a9   : > { %v1391_v19 = vsel %vm1390_vm11, %v3012_v61, %v1387_v9  ;;  %v1942_v46 = vmax.f32 %v1753_v20, 0.0  ;;  %v1960_v24 = vadd.f32 %v1944_v49, %v1928_v53  ;;  %v2710_v53 = vld [vmem:[%s4102_s2 + $0x60] sm:$0xff] }
 0x4aa   : > { %v1956_v2 = vadd.f32 %v1940_v6, %v1924_v23  ;;  %v1396_v30 = vsel %vm1393_vm12, %v1395_v28, %v1391_v19  ;;  %v1909_v23 = vpop.f32.mrf.mxu1 }
 0x4ab   : > { %v3864_v32 = vmul.f32 %v3771_v3, %v1396_v30  ;;  %v3877_v3 = vmul.f32 0.125, %v1957_v33  ;;  %v1958_v62 = vadd.f32 %v1942_v46, %v1926_v59  ;;  %v1910_v51 = vadd.f32 %v3795_v58, %v1909_v23 }
 0x4ac   : > { %v3866_v50 = vmul.f32 0.125, %v1956_v2  ;;  %v3902_v6 = vmul.f32 0.125, %v1960_v24 }
 0x4ad   : > { %2576 = vst.msk [vmem:[%s3543_s16 + $0x78] sm:$0xff] %vm1028_vm2, %v3864_v32  ;;  %2825 = vmatmul.msk.f32.vlgmr.msra.gmra.mxu3 %vm1028_vm2, %v3864_v32  ;;  %v3882_v55 = vmul.f32 0.125, %v1958_v62  ;;  %v1929_v13 = vmax.f32 %v1910_v51, 0.0 }
 0x4ae   : > { %2851 = vmatmul.msk.f32.gmra.mxu2 %vm417_vm1, %v3866_v50 }
 0x4b0   : > { %v1776_v43 = vpop.f32.mrf.mxu3 }
 0x4b1   : > { %v1943_v56 = vmax.f32 %v1776_v43, 0.0 }
 0x4b3   : > { %v1959_v61 = vadd.f32 %v1943_v56, %v1927_v12 }
 0x4b5   : > { %v3893_v7 = vmul.f32 0.125, %v1959_v61 }
 0x4b6   : > { %2852 = vmatmul.msk.f32.gmra.mxu2 %vm417_vm1, %v3877_v3 }
 0x4b7   : > { %v1822_v31 = vpop.f32.mrf.mxu2 }
 0x4b8   : > { %v1945_v28 = vmax.f32 %v1822_v31, 0.0 }
 0x4be   : > { %2853 = vmatmul.msk.f32.gmra.mxu2 %vm417_vm1, %v3882_v55 }
 0x4bf   : > { %v2046_v18 = vpop.f32.mrf.mxu2 }
 0x4c0   : > { %v2047_v45 = vadd.f32 %v3887_v16, %v2046_v18 }
 0x4c2   : > { %2109 = vmatpush.msrb.mxu3 %v2047_v45 }
 0x4c3   : > { %2858 = vmatmul.msk.f32.vlgmr.msrb.gmra.mxu3 %vm1028_vm2, %v3633_v39  ;;  %v1961_v39 = vadd.f32 %v1945_v28, %v1929_v13 }
 0x4c5   : > { %v3909_v2 = vmul.f32 0.125, %v1961_v39 }
 0x4c6   : > { %2854 = vmatmul.msk.f32.gmra.mxu2 %vm417_vm1, %v3893_v7 }
 0x4c7   : > { %v2049_v25 = vpop.f32.mrf.mxu2 }
 0x4c8   : > { %v2050_v9 = vadd.f32 %v3887_v16, %v2049_v25 }
 0x4ca   : > { %2129 = vmatpush.msra.mxu3 %v2050_v9 }
 0x4cb   : > { %2859 = vmatmul.msk.f32.vlgmr.msra.gmra.mxu3 %vm1028_vm2, %v3546_v29 }
 0x4ce   : > { %2855 = vmatmul.msk.f32.gmra.mxu2 %vm417_vm1, %v3902_v6 }
 0x4cf   : > { %v2052_v11 = vpop.f32.mrf.mxu2 }
 0x4d0   : > { %v2053_v19 = vadd.f32 %v3887_v16, %v2052_v11 }
 0x4d2   : > { %2149 = vmatpush.msrb.mxu3 %v2053_v19 }
 0x4d3   : > { %2860 = vmatmul.msk.f32.vlgmr.msrb.gmra.mxu3 %vm1028_vm2, %v3637_v38 }
 0x4d6   : > { %2856 = vmatmul.msk.f32.gmra.mxu2 %vm417_vm1, %v3909_v2 }
 0x4d7   : > { %v2055_v30 = vpop.f32.mrf.mxu2 }
 0x4d8   : > { %v2056_v10 = vadd.f32 %v3887_v16, %v2055_v30 }
 0x4da   : > { %2169 = vmatpush.msra.mxu3 %v2056_v10 }
 0x4db   : > { %2861 = vmatmul.msk.f32.vlgmr.msra.gmra.mxu3 %vm1028_vm2, %v3667_v17 }
 0x4df   : > { %v2058_v29 = vpop.f32.mrf.mxu2 }
 0x4e0   : > { %v2059_v14 = vadd.f32 %v3887_v16, %v2058_v29 }
 0x4e2   : > { %2189 = vmatpush.msrb.mxu3 %v2059_v14 }
 0x4e3   : > { %2862 = vmatmul.msk.f32.vlgmr.msrb.gmra.mxu3 %vm1028_vm2, %v3560_v44 }
 0x4e7   : > { %v2061_v33 = vpop.f32.mrf.mxu2 }
 0x4e8   : > { %v2062_v38 = vadd.f32 %v3887_v16, %v2061_v33 }
 0x4ea   : > { %2209 = vmatpush.msra.mxu3 %v2062_v38 }
 0x4eb   : > { %2863 = vmatmul.msk.f32.vlgmr.msra.gmra.mxu3 %vm1028_vm2, %v3690_v27  ;;  %v1912_v27 = vpop.f32.mrf.mxu1 }
 0x4ec   : > { %v1913_v46 = vadd.f32 %v3795_v58, %v1912_v27 }
 0x4ee   : > { %v1930_v60 = vmax.f32 %v1913_v46, 0.0 }
 0x4f9   : > { %v2064_v5 = vpop.f32.mrf.mxu2 }
 0x4fa   : > { %v2065_v20 = vadd.f32 %v3887_v16, %v2064_v5 }
 0x4fc   : > { %2229 = vmatpush.msrb.mxu3 %v2065_v20 }
 0x4fd   : > { %2864 = vmatmul.msk.f32.vlgmr.msrb.gmra.mxu3 %vm1028_vm2, %v3716_v54 }
 0x501   : > { %v2067_v17 = vpop.f32.mrf.mxu2 }
 0x502   : > { %v2068_v0 = vadd.f32 %v3887_v16, %v2067_v17 }
 0x504   : > { %2249 = vmatpush.msra.mxu3 %v2068_v0 }
 0x505   : > { %2865 = vmatmul.msk.f32.vlgmr.msra.gmra.mxu3 %vm1028_vm2, %v3575_v22 }
 0x509   : > { %v2070_v44 = vpop.f32.mrf.mxu2 }
 0x50a   : > { %v2071_v59 = vadd.f32 %v3887_v16, %v2070_v44 }
 0x50c   : > { %2269 = vmatpush.msrb.mxu3 %v2071_v59 }
 0x50d   : > { %2866 = vmatmul.msk.f32.vlgmr.msrb.gmra.mxu3 %vm1028_vm2, %v3728_v63 }
 0x530   : > { %v1845_v62 = vpop.f32.mrf.mxu3 }
 0x531   : > { %v2073_v54 = vpop.f32.mrf.mxu2  ;;  %v1946_v31 = vmax.f32 %v1845_v62, 0.0 }
 0x532   : > { %v2074_v43 = vadd.f32 %v3887_v16, %v2073_v54 }
 0x533   : > { %v1962_v12 = vadd.f32 %v1946_v31, %v1930_v60 }
 0x534   : > { %2289 = vmatpush.msra.mxu3 %v2074_v43 }
 0x535   : > { %2867 = vmatmul.msk.f32.vlgmr.msra.gmra.mxu3 %vm1028_vm2, %v3758_v48  ;;  %v1978_v22 = vmul.f32 0.125, %v1962_v12 }
 0x537   : > { %2857 = vmatmul.msk.f32.gmra.mxu2 %vm417_vm1, %v1978_v22 }
 0x539   : > { %v2076_v56 = vpop.f32.mrf.mxu2 }
 0x53a   : > { %v2077_v63 = vadd.f32 %v3887_v16, %v2076_v56 }
 0x53c   : > { %2309 = vmatpush.msra.mxu0 %v2077_v63 }
 0x53d   : > { %2868 = vmatmul.msk.f32.vlgmr.msra.gmra.mxu0 %vm1028_vm2, %v3594_v34 }
 0x541   : > { %v2079_v58 = vpop.f32.mrf.mxu2 }
 0x542   : > { %v2080_v57 = vadd.f32 %v3887_v16, %v2079_v58 }
 0x544   : > { %2329 = vmatpush.msrb.mxu3 %v2080_v57 }
 0x545   : > { %2869 = vmatmul.msk.f32.vlgmr.msrb.gmra.mxu3 %vm1028_vm2, %v3766_v15  ;;  %v2713_v15 = vld [vmem:[%s4102_s2 + $0x78] sm:$0xff] }
 0x549   : > { %v2082_v1 = vpop.f32.mrf.mxu2 }
 0x54a   : > { %v2083_v48 = vadd.f32 %v3887_v16, %v2082_v1 }
 0x54c   : > { %2349 = vmatpush.msrb.mxu0 %v2083_v48 }
 0x54d   : > { %2870 = vmatmul.msk.f32.vlgmr.msrb.gmra.mxu0 %vm1028_vm2, %v3790_v52  ;;  %v2712_v52 = vld [vmem:[%s4102_s2 + $0x70] sm:$0xff] }
 0x551   : > { %v2085_v61 = vpop.f32.mrf.mxu2 }
 0x552   : > { %v2086_v18 = vadd.f32 %v3887_v16, %v2085_v61 }
 0x554   : > { %2369 = vmatpush.msra.mxu3 %v2086_v18 }
 0x555   : > { %2871 = vmatmul.msk.f32.vlgmr.msra.gmra.mxu3 %vm1028_vm2, %v3613_v26  ;;  %v2711_v26 = vld [vmem:[%s4102_s2 + $0x68] sm:$0xff] }
 0x559   : > { %v2088_v34 = vpop.f32.mrf.mxu2 }
 0x55a   : > { %v2089_v45 = vadd.f32 %v3887_v16, %v2088_v34 }
 0x55c   : > { %2389 = vmatpush.msra.mxu0 %v2089_v45 }
 0x55d   : > { %2872 = vmatmul.msk.f32.vlgmr.msra.gmra.mxu0 %vm1028_vm2, %v3804_v35 }
 0x55e   : > { %2428 = vmatpush.msrb.mxu0 %v2713_v15 }
 0x560   : > { %2429 = vmatpush.msrb.mxu0 %v2712_v52 }
 0x562   : > { %2430 = vmatpush.msrb.mxu0 %v2711_v26 }
 0x564   : > { %2431 = vmatpush.msrb.mxu0 %v2710_v53 }
 0x565   : > { %2874 = vmatmul.msk.f32.vlgmr.msrb.gmra.mxu0 %vm417_vm1, %v3812_v40 }
 0x56d   : > { %2875 = vmatmul.msk.f32.gmra.mxu0 %vm417_vm1, %v3818_v41 }
 0x575   : > { %2876 = vmatmul.msk.f32.gmra.mxu0 %vm417_vm1, %v3823_v36 }
 0x57d   : > { %2877 = vmatmul.msk.f32.gmra.mxu0 %vm417_vm1, %v3828_v47  ;;  %v2111_v47 = vpop.f32.mrf.mxu3 }
 0x585   : > { %2878 = vmatmul.msk.f32.gmra.mxu0 %vm417_vm1, %v3834_v8 }
 0x58d   : > { %2879 = vmatmul.msk.f32.gmra.mxu0 %vm417_vm1, %v3838_v37  ;;  %v2131_v37 = vpop.f32.mrf.mxu3 }
 0x58e   : > { %v2498_v49 = vmax.f32 %v2131_v37, 0.0 }
 0x595   : > { %2880 = vmatmul.msk.f32.gmra.mxu0 %vm417_vm1, %v3844_v21  ;;  %v4008_v21 = vld [vmem:[%s4103_s3 + $0x5] ss:$0 sm:$0xff] }
 0x59d   : > { %2881 = vmatmul.msk.f32.gmra.mxu0 %vm417_vm1, %v3850_v4 }
 0x5a5   : > { %2882 = vmatmul.msk.f32.gmra.mxu0 %vm417_vm1, %v3854_v42 }
 0x5ad   : > { %2883 = vmatmul.msk.f32.gmra.mxu0 %vm417_vm1, %v3866_v50 }
 0x5b5   : > { %2884 = vmatmul.msk.f32.gmra.mxu0 %vm417_vm1, %v3877_v3 }
 0x5ba   : > { %v2091_v35 = vpop.f32.mrf.mxu2  ;;  %v3994_v41 = vpop.f32.mrf.mxu0 }
 0x5bb   : > { %v2092_v40 = vadd.f32 %v3887_v16, %v2091_v35 }
 0x5bd   : > { %2885 = vmatmul.msk.f32.gmra.mxu0 %vm417_vm1, %v3882_v55  ;;  %2409 = vmatpush.msrb.mxu3 %v2092_v40  ;;  %v2151_v55 = vpop.f32.mrf.mxu3 }
 0x5be   : > { %2873 = vmatmul.msk.f32.vlgmr.msrb.gmra.mxu3 %vm1028_vm2, %v3864_v32  ;;  %v2497_v32 = vmax.f32 %v2111_v47, 0.0  ;;  %v2499_v28 = vmax.f32 %v2151_v55, 0.0 }
 0x5c5   : > { %2886 = vmatmul.msk.f32.gmra.mxu0 %vm417_vm1, %v3893_v7  ;;  %v2171_v9 = vpop.f32.mrf.mxu3 }
 0x5c6   : > { %v2500_v29 = vmax.f32 %v2171_v9, 0.0 }
 0x5ca   : > { %v3998_v36 = vpop.f32.mrf.mxu0 }
 0x5cd   : > { %2887 = vmatmul.msk.f32.gmra.mxu0 %vm417_vm1, %v3902_v6  ;;  %v2191_v10 = vpop.f32.mrf.mxu3 }
 0x5ce   : > { %v2501_v17 = vmax.f32 %v2191_v10, 0.0  ;;  %v2509_v10 = vmax.f32 %v3998_v36, 0.0 }
 0x5d5   : > { %2888 = vmatmul.msk.f32.gmra.mxu0 %vm417_vm1, %v3909_v2  ;;  %v2211_v44 = vpop.f32.mrf.mxu3 }
 0x5d6   : > { %v2502_v62 = vmax.f32 %v2211_v44, 0.0 }
 0x5da   : > { %v4002_v8 = vpop.f32.mrf.mxu0 }
 0x5dd   : > { %2889 = vmatmul.msk.f32.gmra.mxu0 %vm417_vm1, %v1978_v22  ;;  %v2231_v31 = vpop.f32.mrf.mxu3 }
 0x5de   : > { %v2503_v63 = vmax.f32 %v2231_v31, 0.0 }
 0x5e2   : > { %v2433_v4 = vpop.f32.mrf.mxu0 }
 0x5e3   : > { %v2434_v42 = vadd.f32 %v4008_v21, %v2433_v4 }
 0x5e5   : > { %v2481_v50 = vmax.f32 %v2434_v42, 0.0  ;;  %v2251_v1 = vpop.f32.mrf.mxu3 }
 0x5e6   : > { %v2504_v34 = vmax.f32 %v2251_v1, 0.0 }
 0x5e7   : > { %v2513_v3 = vadd.f32 %v2497_v32, %v2481_v50 }
 0x5e9   : > { %v2529_v16 = vmul.f32 0.125, %v2513_v3 }
 0x5ea   : > { %v2436_v7 = vpop.f32.mrf.mxu0 }
 0x5eb   : > { %2545 = vst.msk [vmem:[%s4014_s15] sm:$0xff] %vm417_vm1, %v2529_v16  ;;  %v2437_v23 = vadd.f32 %v4008_v21, %v2436_v7 }
 0x5ed   : > { %v2482_v24 = vmax.f32 %v2437_v23, 0.0  ;;  %v2271_v26 = vpop.f32.mrf.mxu3 }
 0x5ee   : > { %v2505_v40 = vmax.f32 %v2271_v26, 0.0 }
 0x5ef   : > { %v2514_v51 = vadd.f32 %v2498_v49, %v2482_v24  ;;  %v2507_v24 = vmax.f32 %v3994_v41, 0.0 }
 0x5f1   : > { %v2530_v25 = vmul.f32 0.125, %v2514_v51 }
 0x5f2   : > { %v2439_v6 = vpop.f32.mrf.mxu0 }
 0x5f3   : > { %2546 = vst.msk [vmem:[%s4014_s15 + $0x8] sm:$0xff] %vm417_vm1, %v2530_v25  ;;  %v2440_v13 = vadd.f32 %v4008_v21, %v2439_v6 }
 0x5f5   : > { %v2483_v39 = vmax.f32 %v2440_v13, 0.0  ;;  %v2291_v42 = vpop.f32.mrf.mxu3 }
 0x5f6   : > { %v2506_v3 = vmax.f32 %v2291_v42, 0.0 }
 0x5f7   : > { %v2515_v11 = vadd.f32 %v2499_v28, %v2483_v39 }
 0x5f9   : > { %v2531_v19 = vmul.f32 0.125, %v2515_v11 }
 0x5fa   : > { %v2442_v2 = vpop.f32.mrf.mxu0 }
 0x5fb   : > { %2547 = vst.msk [vmem:[%s4014_s15 + $0x10] sm:$0xff] %vm417_vm1, %v2531_v19  ;;  %v2443_v30 = vadd.f32 %v4008_v21, %v2442_v2 }
 0x5fd   : > { %v2484_v14 = vmax.f32 %v2443_v30, 0.0  ;;  %v2331_v6 = vpop.f32.mrf.mxu3 }
 0x5fe   : > { %v2508_v39 = vmax.f32 %v2331_v6, 0.0 }
 0x5ff   : > { %v2516_v33 = vadd.f32 %v2500_v29, %v2484_v14 }
 0x601   : > { %v2532_v38 = vmul.f32 0.125, %v2516_v33 }
 0x602   : > { %v2445_v5 = vpop.f32.mrf.mxu0 }
 0x603   : > { %2548 = vst.msk [vmem:[%s4014_s15 + $0x18] sm:$0xff] %vm417_vm1, %v2532_v38  ;;  %v2446_v20 = vadd.f32 %v4008_v21, %v2445_v5 }
 0x605   : > { %v2485_v0 = vmax.f32 %v2446_v20, 0.0  ;;  %v2371_v38 = vpop.f32.mrf.mxu3 }
 0x607   : > { %v2517_v59 = vadd.f32 %v2501_v17, %v2485_v0  ;;  %v2510_v17 = vmax.f32 %v2371_v38, 0.0 }
 0x609   : > { %v2533_v27 = vmul.f32 0.125, %v2517_v59 }
 0x60a   : > { %v2448_v46 = vpop.f32.mrf.mxu0 }
 0x60b   : > { %2549 = vst.msk [vmem:[%s4014_s15 + $0x20] sm:$0xff] %vm417_vm1, %v2533_v27  ;;  %v2449_v60 = vadd.f32 %v4008_v21, %v2448_v46  ;;  %v2511_v46 = vmax.f32 %v4002_v8, 0.0 }
 0x60d   : > { %v2486_v54 = vmax.f32 %v2449_v60, 0.0 }
 0x60f   : > { %v2518_v43 = vadd.f32 %v2502_v62, %v2486_v54 }
 0x611   : > { %v2534_v12 = vmul.f32 0.125, %v2518_v43 }
 0x612   : > { %v2451_v22 = vpop.f32.mrf.mxu0 }
 0x613   : > { %2550 = vst.msk [vmem:[%s4014_s15 + $0x28] sm:$0xff] %vm417_vm1, %v2534_v12  ;;  %v2452_v56 = vadd.f32 %v4008_v21, %v2451_v22 }
 0x615   : > { %v2487_v58 = vmax.f32 %v2452_v56, 0.0 }
 0x617   : > { %v2519_v57 = vadd.f32 %v2503_v63, %v2487_v58 }
 0x619   : > { %v2535_v48 = vmul.f32 0.125, %v2519_v57 }
 0x61a   : > { %v2454_v61 = vpop.f32.mrf.mxu0 }
 0x61b   : > { %2551 = vst.msk [vmem:[%s4014_s15 + $0x30] sm:$0xff] %vm417_vm1, %v2535_v48  ;;  %v2455_v18 = vadd.f32 %v4008_v21, %v2454_v61 }
 0x61d   : > { %v2488_v45 = vmax.f32 %v2455_v18, 0.0 }
 0x61f   : > { %v2520_v15 = vadd.f32 %v2504_v34, %v2488_v45 }
 0x621   : > { %v2536_v52 = vmul.f32 0.125, %v2520_v15 }
 0x622   : > { %v2457_v53 = vpop.f32.mrf.mxu0 }
 0x623   : > { %2552 = vst.msk [vmem:[%s4014_s15 + $0x38] sm:$0xff] %vm417_vm1, %v2536_v52  ;;  %v2458_v35 = vadd.f32 %v4008_v21, %v2457_v53 }
 0x625   : > { %v2489_v47 = vmax.f32 %v2458_v35, 0.0 }
 0x627   : > { %v2521_v37 = vadd.f32 %v2505_v40, %v2489_v47 }
 0x629   : > { %v2537_v4 = vmul.f32 0.125, %v2521_v37 }
 0x62a   : > { %v2460_v32 = vpop.f32.mrf.mxu0 }
 0x62b   : > { %2553 = vst.msk [vmem:[%s4014_s15 + $0x40] sm:$0xff] %vm417_vm1, %v2537_v4  ;;  %v2461_v50 = vadd.f32 %v4008_v21, %v2460_v32 }
 0x62d   : > { %v2490_v55 = vmax.f32 %v2461_v50, 0.0 }
 0x62f   : > { %v2522_v16 = vadd.f32 %v2506_v3, %v2490_v55 }
 0x631   : > { %v2538_v7 = vmul.f32 0.125, %v2522_v16 }
 0x632   : > { %v2463_v23 = vpop.f32.mrf.mxu0 }
 0x633   : > { %2554 = vst.msk [vmem:[%s4014_s15 + $0x48] sm:$0xff] %vm417_vm1, %v2538_v7  ;;  %v2464_v49 = vadd.f32 %v4008_v21, %v2463_v23 }
 0x635   : > { %v2491_v51 = vmax.f32 %v2464_v49, 0.0 }
 0x637   : > { %v2523_v25 = vadd.f32 %v2507_v24, %v2491_v51 }
 0x639   : > { %v2539_v9 = vmul.f32 0.125, %v2523_v25 }
 0x63a   : > { %v2466_v13 = vpop.f32.mrf.mxu0 }
 0x63b   : > { %2555 = vst.msk [vmem:[%s4014_s15 + $0x50] sm:$0xff] %vm417_vm1, %v2539_v9  ;;  %v2467_v28 = vadd.f32 %v4008_v21, %v2466_v13 }
 0x63d   : > { %v2492_v11 = vmax.f32 %v2467_v28, 0.0 }
 0x63f   : > { %v2524_v19 = vadd.f32 %v2508_v39, %v2492_v11 }
 0x641   : > { %v2540_v2 = vmul.f32 0.125, %v2524_v19  ;;  %v2411_v31 = vpop.f32.mrf.mxu3 }
 0x642   : > { %v2469_v30 = vpop.f32.mrf.mxu0  ;;  %v2512_v22 = vmax.f32 %v2411_v31, 0.0 }
 0x643   : > { %2556 = vst.msk [vmem:[%s4014_s15 + $0x58] sm:$0xff] %vm417_vm1, %v2540_v2  ;;  %v2470_v41 = vadd.f32 %v4008_v21, %v2469_v30 }
 0x645   : > { %v2493_v29 = vmax.f32 %v2470_v41, 0.0 }
 0x647   : > { %v2525_v14 = vadd.f32 %v2509_v10, %v2493_v29 }
 0x649   : > { %v2541_v33 = vmul.f32 0.125, %v2525_v14 }
 0x64a   : > { %v2472_v5 = vpop.f32.mrf.mxu0 }
 0x64b   : > { %2557 = vst.msk [vmem:[%s4014_s15 + $0x60] sm:$0xff] %vm417_vm1, %v2541_v33  ;;  %v2473_v20 = vadd.f32 %v4008_v21, %v2472_v5 }
 0x64d   : > { %v2494_v0 = vmax.f32 %v2473_v20, 0.0 }
 0x64f   : > { %v2526_v44 = vadd.f32 %v2510_v17, %v2494_v0 }
 0x651   : > { %v2542_v59 = vmul.f32 0.125, %v2526_v44 }
 0x652   : > { %v2475_v27 = vpop.f32.mrf.mxu0 }
 0x653   : > { %2558 = vst.msk [vmem:[%s4014_s15 + $0x68] sm:$0xff] %vm417_vm1, %v2542_v59  ;;  %v2476_v36 = vadd.f32 %v4008_v21, %v2475_v27 }
 0x655   : > { %v2495_v60 = vmax.f32 %v2476_v36, 0.0 }
 0x657   : > { %v2527_v62 = vadd.f32 %v2511_v46, %v2495_v60 }
 0x659   : > { %v2543_v54 = vmul.f32 0.125, %v2527_v62 }
 0x65a   : > { %v2478_v43 = vpop.f32.mrf.mxu0 }
 0x65b   : > { %2559 = vst.msk [vmem:[%s4014_s15 + $0x70] sm:$0xff] %vm417_vm1, %v2543_v54  ;;  %v2479_v12 = vadd.f32 %v4008_v21, %v2478_v43 }
 0x65d   : > { %v2496_v56 = vmax.f32 %v2479_v12, 0.0 }
 0x65f   : > { %v2528_v8 = vadd.f32 %v2512_v22, %v2496_v56 }
 0x661   : > { %v2544_v63 = vmul.f32 0.125, %v2528_v8 }
 0x663   : > { %2560 = vst.msk [vmem:[%s4014_s15 + $0x78] sm:$0xff] %vm417_vm1, %v2544_v63 }
 0x664   : > { %3057 = shalt.err (!%p3054_p3)
}
 0x665   : > { %s3094_s12 = smov 128   ;;  %s3095_s14 = smov 8  }
 0x666   : > { %2902 = dma.vmem_to_hbm [thread:$0]  (%p3164_p5), %s2596_s23, 2048, %s2598_s13, %s2578_s22, %s3094_s12, %s3094_s12, %s3095_s14  }
 0x667 PF: > { %p2908_p4 = scmp.ge.s32.totalorder %s3092_s21, 2  ;;  %s2616_s15 = sand.u32 1, %s3080_s18  }
 0x668   : > { %s2617_s9 = scalar_lea.sflag [#allocation3], %s2616_s15 }
 0x669   : > { %p2905_p7 = pnand %p2908_p4, %p3168_p6 }
 0x66b   : > { %p2906_p8 = pneg %p2905_p7 }
 0x66d   : > { %3075 = dma.done.wait (%p2906_p8), %s2617_s9, 2048  }
 0x66e   : > { %3077 = vsyncadd (%p2906_p8), %s2617_s9, 4294965248  ;;  %p16_p9 = scmp.ge.s32.totalorder %s3151_s24, 4   ;;  %s4108_s18 = smov %s3084_s19 }
 0x66f   : > { %s4109_s19 = smov %s3088_s20  ;;  %s4110_s20 = smov %s3162_s27 }
 0x670   : > { %s4111_s21 = smov %s3151_s24  ;;  %18 = sbr.rel (!%p16_p9) target bundleno = 3 (0x3), region = 88 }
 0x675   :  { %2631 = vsyncpa [#allocation3], 1 }
 0x676   :  { %2633 = vsyncpa [#allocation3 + $0x1], 1 }

</bundles_post_ra>
